<compile_context>
chip_gen: v6e
topology: v6e:2x2x1
jax: 0.10.0
libtpu: 0.0.40
codegen_flags: <defaults>
</compile_context>

<pallas_src>
import functools

import jax
import jax.numpy as jnp
from jax.experimental import pallas as pl
from jax.experimental.pallas import tpu as pltpu

_VMEM_LIMIT_BYTES = 32 * 1024 * 1024   # explicit scoped-VMEM budget (all gens)
_COMPUTE_DTYPE = jnp.bfloat16


# ------------------------------- helpers ------------------------------------

def _round_up(x, m):
    return ((x + m - 1) // m) * m


def _pad_axis(a, axis, target):
    """Zero-pad `axis` of `a` up to length `target` (no-op if already there)."""
    pad = target - a.shape[axis]
    if pad <= 0:
        return a
    widths = [(0, 0)] * a.ndim
    widths[axis] = (0, pad)
    return jnp.pad(a, widths)


def _padded_kk(cin, k):
    """Per-channel k*k extent padded so K = cin * kk is a sublane multiple."""
    kk = k * k
    if (cin * kk) % 8 == 0:
        return kk
    return _round_up(kk, 8)   # covers cin == 1 (conv1); conv2 (K=400) needs none


def _choose_images_per_tile(b_pad, per_image_m, max_lanes):
    """Images per grid tile: a multiple of 8 (=> tile lanes a multiple of 128),
    tile lanes <= max_lanes (VMEM budget), preferring >= 2 tiles (v7x 2 TCs)."""
    assert b_pad % 8 == 0
    cands = [c for c in (128, 64, 32, 16, 8)
             if b_pad % c == 0 and c * per_image_m <= max_lanes]
    if not cands:
        return 8
    multi = [c for c in cands if b_pad // c >= 2]
    return multi[0] if multi else cands[0]


def _choose_tile_lanes(m, max_tm):
    """Largest 128-multiple divisor of m (m itself a multiple of 128) that is
    <= max_tm, preferring >= 2 grid tiles."""
    divs = [t for t in range(128, min(m, max_tm) + 1, 128) if m % t == 0]
    if not divs:
        return m
    multi = [t for t in divs if m // t >= 2]
    return max(multi) if multi else max(divs)


# ----------------------------- Pallas kernels --------------------------------

def _conv_relu_pool_kernel(w_ref, x_ref, b_ref, o_ref, *, tm):
    """One MXU push covering all four 2x2 pooling shifts.

    w_ref: (Cout, Kp)   bf16  conv weights, K = Cin*k*k (zero padded)
    x_ref: (Kp, 4*tm)   bf16  im2col tile; 4 contiguous tm-wide sub-slabs,
                              one per pooling shift (di, dj)
    b_ref: (Cout, 1)    f32   bias
    o_ref: (Cout, tm)         pooled + bias + ReLU output tile
    """
    acc = jnp.dot(w_ref[...], x_ref[...], preferred_element_type=jnp.float32)
    pooled = jnp.maximum(
        jnp.maximum(acc[:, 0 * tm:1 * tm], acc[:, 1 * tm:2 * tm]),
        jnp.maximum(acc[:, 2 * tm:3 * tm], acc[:, 3 * tm:4 * tm]))
    o_ref[...] = jnp.maximum(pooled + b_ref[...], 0.0).astype(o_ref.dtype)


def _linear_kernel(w_ref, x_ref, b_ref, o_ref):
    """out(N, M) = W(N, K) @ X(K, M) + b (no activation)."""
    acc = jnp.dot(w_ref[...], x_ref[...], preferred_element_type=jnp.float32)
    o_ref[...] = (acc + b_ref[...]).astype(o_ref.dtype)


# ------------------------------- im2col glue ---------------------------------

def _conv_pool_slab(x_cm, k, q, kp):
    """Channel-major (C, B, H, W) -> im2col slab (Kp, (B//q) * 4 * q*Ho2*Wo2).

    Per image-group tile of q images, the four 2x2-pooling-shift sub-slabs are
    laid out contiguously (slab index outermost within the tile's lane range),
    so one wide matmul + 3 lane-slice maxima performs conv + max-pool.
    K zero-padding is folded into the shift stack so the inflated slab is
    materialized exactly once (single stack + single transpose).
    """
    C, B, H, W = x_cm.shape
    Ho, Wo = H - k + 1, W - k + 1
    Ho2, Wo2 = Ho // 2, Wo // 2
    assert B % q == 0 and Ho % 2 == 0 and Wo % 2 == 0
    assert kp % C == 0 and kp // C >= k * k
    nt = B // q
    nkk = kp // C
    slices = [x_cm[:, :, kh:kh + Ho, kw:kw + Wo]
              for kh in range(k) for kw in range(k)]
    if nkk > k * k:                       # fold per-channel K padding in here
        slices += [jnp.zeros_like(slices[0])] * (nkk - k * k)
    shifts = jnp.stack(slices, axis=0)    # (nkk, C, B, Ho, Wo)
    shifts = shifts.reshape(nkk, C, nt, q, Ho2, 2, Wo2, 2)
    # (kk, C, Bo, Bi, i, di, j, dj) -> (C, kk, Bo, di, dj, Bi, i, j)
    g = jnp.transpose(shifts, (1, 0, 2, 5, 7, 3, 4, 6))
    return g.reshape(kp, nt * 4 * q * Ho2 * Wo2)


# ------------------------------- wrappers ------------------------------------

def conv_relu_pool(x_cm, wm, b, *, k, images_per_tile, out_dtype=_COMPUTE_DTYPE):
    """Fused Conv2d(k, stride=1, pad=0) + bias + ReLU + MaxPool2d(2).

    x_cm: (Cin, B, H, W) channel-major (B a multiple of images_per_tile).
    wm:   (Cout, Kp) bf16.   b: (Cout, 1) f32.
    Returns (Cout, B, Ho//2, Wo//2) channel-major (pure reshape of the kernel
    output -- no layer-boundary transpose)."""
    C, B, H, W = x_cm.shape
    cout, kp = wm.shape
    Ho2, Wo2 = (H - k + 1) // 2, (W - k + 1) // 2
    q = images_per_tile
    nt = B // q
    tm = q * Ho2 * Wo2                    # output lanes per tile
    assert tm % 128 == 0                  # lane-dense unmasked stores

    # bf16 BEFORE the im2col stack/transpose (halves the glue bytes); no-op
    # for layer 2 whose input is already bf16.
    slab = _conv_pool_slab(x_cm.astype(_COMPUTE_DTYPE), k, q, kp)

    out = pl.pallas_call(
        functools.partial(_conv_relu_pool_kernel, tm=tm),
        out_shape=jax.ShapeDtypeStruct((cout, nt * tm), out_dtype),
        grid_spec=pltpu.PrefetchScalarGridSpec(
            num_scalar_prefetch=0,
            grid=(nt,),
            in_specs=[
                pl.BlockSpec((cout, kp), lambda i: (0, 0)),      # weights, resident
                pl.BlockSpec((kp, 4 * tm), lambda i: (0, i)),    # im2col tile
                pl.BlockSpec((cout, 1), lambda i: (0, 0)),       # bias, resident
            ],
            out_specs=pl.BlockSpec((cout, tm), lambda i: (0, i)),
        ),
        compiler_params=pltpu.CompilerParams(
            dimension_semantics=("parallel",),
            vmem_limit_bytes=_VMEM_LIMIT_BYTES),
    )(wm, slab, b)
    return out.reshape(cout, B, Ho2, Wo2)


def linear(x_t, wm, b, *, n_out, n_batch, out_dtype=jnp.float32):
    """logits = (W(Np,K) @ x_t(K,M) + b)[:n_out, :n_batch].T, lanes = batch."""
    n_pad, kd = wm.shape
    kd2, m = x_t.shape
    assert kd == kd2
    mp = _round_up(m, 128)                # lane-pad the batch, slice after
    x_t = _pad_axis(x_t, 1, mp)
    tm = _choose_tile_lanes(mp, 2048)
    out = pl.pallas_call(
        _linear_kernel,
        out_shape=jax.ShapeDtypeStruct((n_pad, mp), out_dtype),
        grid_spec=pltpu.PrefetchScalarGridSpec(
            num_scalar_prefetch=0,
            grid=(mp // tm,),
            in_specs=[
                pl.BlockSpec((n_pad, kd), lambda i: (0, 0)),
                pl.BlockSpec((kd, tm), lambda i: (0, i)),
                pl.BlockSpec((n_pad, 1), lambda i: (0, 0)),
            ],
            out_specs=pl.BlockSpec((n_pad, tm), lambda i: (0, i)),
        ),
        compiler_params=pltpu.CompilerParams(
            dimension_semantics=("parallel",),
            vmem_limit_bytes=_VMEM_LIMIT_BYTES),
    )(wm, x_t, b)
    return out[:n_out, :n_batch].T


# ------------------------------ parameters -----------------------------------

def init_params(key):
    """Deterministic synthetic parameters matching CNNModel.__init__ shapes."""
    k1, k2, k3, k4, k5, k6 = jax.random.split(key, 6)
    return {
        "w1": jax.random.normal(k1, (16, 1, 5, 5), jnp.float32) * 0.1,
        "b1": jax.random.normal(k2, (16,), jnp.float32) * 0.1,
        "w2": jax.random.normal(k3, (32, 16, 5, 5), jnp.float32) * 0.05,
        "b2": jax.random.normal(k4, (32,), jnp.float32) * 0.05,
        "wfc": jax.random.normal(k5, (10, 32 * 4 * 4), jnp.float32) * 0.05,
        "bfc": jax.random.normal(k6, (10,), jnp.float32) * 0.05,
    }


def _prep_conv_weight(w):
    cout, cin, k, _ = w.shape
    nkk = _padded_kk(cin, k)
    wm = _pad_axis(w.reshape(cout, cin, k * k), 2, nkk)   # per-channel K pad
    wm = wm.reshape(cout, cin * nkk)
    assert wm.shape[1] % 8 == 0
    return wm.astype(_COMPUTE_DTYPE)


def prepare_params(params):
    """One-time prep (outside the jit): conv weights -> (Cout, Cin*kk_pad) bf16
    with per-channel zero K-padding matching the im2col slab; FC weight row-
    padded 10 -> 16 and kept (N, K) -- no permutation needed because the
    channel-major flatten order (c*16 + i*4 + j) matches PyTorch's view(B,-1)."""
    return {
        "wm1": _prep_conv_weight(params["w1"]),
        "b1": params["b1"].reshape(-1, 1).astype(jnp.float32),
        "wm2": _prep_conv_weight(params["w2"]),
        "b2": params["b2"].reshape(-1, 1).astype(jnp.float32),
        "wfc": _pad_axis(params["wfc"], 0, 16).astype(_COMPUTE_DTYPE),
        "bfc": _pad_axis(params["bfc"].reshape(-1, 1), 0, 16).astype(jnp.float32),
    }


# ------------------------------- forward -------------------------------------

@jax.jit
def cnn_model_forward(prepared, x):
    """x: (B, 1, 28, 28) f32 NCHW -> logits (B, 10) f32 (eval mode)."""
    B = x.shape[0]
    b_pad = _round_up(max(B, 8), 8)       # whole-image tiles => 128-lane tiles
    # (B,1,28,28) -> channel-major (1,B,28,28): size-1 axis move, free.
    x_cm = jnp.transpose(x, (1, 0, 2, 3)).astype(_COMPUTE_DTYPE)
    x_cm = _pad_axis(x_cm, 1, b_pad)

    # layer 1: 28x28 -> pooled 12x12 (144 lanes / image, K=32 -> cheap blocks)
    q1 = _choose_images_per_tile(b_pad, 144, max_lanes=4608)
    a1 = conv_relu_pool(x_cm, prepared["wm1"], prepared["b1"],
                        k=5, images_per_tile=q1)          # (16, b_pad, 12, 12)

    # layer 2: 12x12 -> pooled 4x4 (16 lanes / image); tile capped at 2048
    # lanes so the double-buffered 400 x (4*2048) bf16 blocks (2 x 6.4 MiB)
    # stay comfortably inside v7x's 64 MiB VMEM.
    q2 = _choose_images_per_tile(b_pad, 16, max_lanes=2048)
    a2 = conv_relu_pool(a1, prepared["wm2"], prepared["b2"],
                        k=5, images_per_tile=q2)          # (32, b_pad, 4, 4)

    # TODO(synk): nn.Dropout(p=0.5) is identity in eval mode; training-mode
    # stochastic masking is not implemented.
    # Flatten to (K=512, B): K order c*16 + p already matches PyTorch, so only
    # this tiny (32, B, 16) -> (32, 16, B) transpose remains before the FC.
    x_t = jnp.transpose(a2.reshape(32, b_pad, 16), (0, 2, 1)).reshape(512, b_pad)
    return linear(x_t, prepared["wfc"], prepared["bfc"],
                  n_out=10, n_batch=B)                    # (B, 10) f32


# ------------------------------ reference ------------------------------------

def _reference_forward(params, x):
    """Pure-JAX f32 reference matching the PyTorch module (eval mode)."""
    def conv(y, w, b):
        y = jax.lax.conv_general_dilated(
            y, w, window_strides=(1, 1), padding="VALID",
            dimension_numbers=("NCHW", "OIHW", "NCHW"))
        return y + b.reshape(1, -1, 1, 1)

    def pool2(y):
        n, c, h, w = y.shape
        return y.reshape(n, c, h // 2, 2, w // 2, 2).max(axis=(3, 5))

    out = pool2(jnp.maximum(conv(x, params["w1"], params["b1"]), 0.0))
    out = pool2(jnp.maximum(conv(out, params["w2"], params["b2"]), 0.0))
    out = out.reshape(out.shape[0], -1)
    return out @ params["wfc"].T + params["bfc"]


if __name__ == "__main__":
    key = jax.random.PRNGKey(0)
    pkey, xkey = jax.random.split(key)
    params = init_params(pkey)
    prepared = prepare_params(params)
    # batch=2: minimal KMNIST-shaped case (28x28 required by fc1 = 32*4*4);
    # batch=16: exercises the multi-tile (grid >= 2) path and batch padding.
    for batch in (2, 16):
        x = jax.random.normal(jax.random.fold_in(xkey, batch),
                              (batch, 1, 28, 28), jnp.float32)
        logits = cnn_model_forward(prepared, x)
        jax.block_until_ready(logits)
        assert logits.shape == (batch, 10) and logits.dtype == jnp.float32
        assert bool(jnp.all(jnp.isfinite(logits)))
        ref = _reference_forward(params, x)
        err = float(jnp.max(jnp.abs(logits - ref)))
        # bf16 weights/activations with f32 MXU accumulation vs f32 reference.
        assert err < 5e-2, f"max |logits - ref| = {err}"
    print("KERNEL_OK")
</pallas_src>

<mosaic_0001>
module attributes {stable_mosaic.version = 11 : i64} {
  func.func @_conv_relu_pool_kernel(%arg0: i32, %arg1: memref<16x32xbf16, #tpu.memory_space<vmem>>, %arg2: memref<32x4608xbf16, #tpu.memory_space<vmem>>, %arg3: memref<16x1xf32, #tpu.memory_space<vmem>>, %arg4: memref<16x1152xbf16, #tpu.memory_space<vmem>>) attributes {dimension_semantics = [#tpu.dimension_semantics<parallel>], iteration_bounds = array<i64: 1>, scalar_prefetch = 0 : i64, scratch_operands = 0 : i64, tpu.core_type = #tpu.core_type<tc>, window_params = [{pipeline_mode = #tpu.pipeline_mode<synchronous>, transform_indices = @transform_0, window_bounds = array<i64: 16, 32>}, {transform_indices = @transform_1, window_bounds = array<i64: 32, 4608>}, {pipeline_mode = #tpu.pipeline_mode<synchronous>, transform_indices = @transform_2, window_bounds = array<i64: 16, 1>}, {transform_indices = @transform_3, window_bounds = array<i64: 16, 1152>}]} {
    %c0 = arith.constant 0 : index
    %c0_0 = arith.constant 0 : index
    %0 = vector.load %arg1[%c0, %c0_0] : memref<16x32xbf16, #tpu.memory_space<vmem>>, vector<16x32xbf16>
    %c0_1 = arith.constant 0 : index
    %c0_2 = arith.constant 0 : index
    %1 = vector.load %arg2[%c0_1, %c0_2] : memref<32x4608xbf16, #tpu.memory_space<vmem>>, vector<32x4608xbf16>
    %cst = arith.constant dense<0.000000e+00> : vector<16x4608xf32>
    %2 = tpu.matmul %0, %1, %cst {dimension_numbers = #tpu.dot_dimension_numbers<[1], [0], [0], [1], [0, 0, 1, 1], [], []>} : vector<16x32xbf16>, vector<32x4608xbf16>, vector<16x4608xf32> -> vector<16x4608xf32>
    %3 = vector.extract_strided_slice %2 {offsets = [0, 0], sizes = [16, 1152], strides = [1, 1]} : vector<16x4608xf32> to vector<16x1152xf32>
    %4 = vector.extract_strided_slice %2 {offsets = [0, 1152], sizes = [16, 1152], strides = [1, 1]} : vector<16x4608xf32> to vector<16x1152xf32>
    %5 = arith.maximumf %3, %4 : vector<16x1152xf32>
    %6 = vector.extract_strided_slice %2 {offsets = [0, 2304], sizes = [16, 1152], strides = [1, 1]} : vector<16x4608xf32> to vector<16x1152xf32>
    %7 = vector.extract_strided_slice %2 {offsets = [0, 3456], sizes = [16, 1152], strides = [1, 1]} : vector<16x4608xf32> to vector<16x1152xf32>
    %8 = arith.maximumf %6, %7 : vector<16x1152xf32>
    %9 = arith.maximumf %5, %8 : vector<16x1152xf32>
    %c0_3 = arith.constant 0 : index
    %c0_4 = arith.constant 0 : index
    %10 = vector.load %arg3[%c0_3, %c0_4] : memref<16x1xf32, #tpu.memory_space<vmem>>, vector<16x1xf32>
    %11 = vector.broadcast %10 : vector<16x1xf32> to vector<16x1152xf32>
    %12 = arith.addf %9, %11 : vector<16x1152xf32>
    %cst_5 = arith.constant 0.000000e+00 : f32
    %13 = vector.broadcast %cst_5 : f32 to vector<16x1152xf32>
    %14 = arith.maximumf %12, %13 : vector<16x1152xf32>
    %15 = arith.truncf %14 : vector<16x1152xf32> to vector<16x1152xbf16>
    %c0_6 = arith.constant 0 : index
    %c0_7 = arith.constant 0 : index
    %16 = vector.load %arg4[%c0_6, %c0_7] : memref<16x1152xbf16, #tpu.memory_space<vmem>>, vector<16x1152xbf16>
    tpu.vector_store %arg4[%c0_6, %c0_7], %15 {strides = array<i32>} : memref<16x1152xbf16, #tpu.memory_space<vmem>>, vector<16x1152xbf16>,
    return
  }
  func.func @transform_0(%arg0: i32) -> (i32, i32) {
    %c0_i32 = arith.constant 0 : i32
    %c0_i32_0 = arith.constant 0 : i32
    %c0_i32_1 = arith.constant 0 : i32
    return %c0_i32, %c0_i32_0 : i32, i32
  }
  func.func @transform_1(%arg0: i32) -> (i32, i32) {
    %c0_i32 = arith.constant 0 : i32
    %c0_i32_0 = arith.constant 0 : i32
    return %c0_i32, %arg0 : i32, i32
  }
  func.func @transform_2(%arg0: i32) -> (i32, i32) {
    %c0_i32 = arith.constant 0 : i32
    %c0_i32_0 = arith.constant 0 : i32
    %c0_i32_1 = arith.constant 0 : i32
    return %c0_i32, %c0_i32_0 : i32, i32
  }
  func.func @transform_3(%arg0: i32) -> (i32, i32) {
    %c0_i32 = arith.constant 0 : i32
    %c0_i32_0 = arith.constant 0 : i32
    return %c0_i32, %arg0 : i32, i32
  }
}

module attributes {stable_mosaic.version = 11 : i64} {
  func.func @_conv_relu_pool_kernel(%arg0: i32, %arg1: memref<32x400xbf16, #tpu.memory_space<vmem>>, %arg2: memref<400x512xbf16, #tpu.memory_space<vmem>>, %arg3: memref<32x1xf32, #tpu.memory_space<vmem>>, %arg4: memref<32x128xbf16, #tpu.memory_space<vmem>>) attributes {dimension_semantics = [#tpu.dimension_semantics<parallel>], iteration_bounds = array<i64: 1>, scalar_prefetch = 0 : i64, scratch_operands = 0 : i64, tpu.core_type = #tpu.core_type<tc>, window_params = [{pipeline_mode = #tpu.pipeline_mode<synchronous>, transform_indices = @transform_0, window_bounds = array<i64: 32, 400>}, {transform_indices = @transform_1, window_bounds = array<i64: 400, 512>}, {pipeline_mode = #tpu.pipeline_mode<synchronous>, transform_indices = @transform_2, window_bounds = array<i64: 32, 1>}, {transform_indices = @transform_3, window_bounds = array<i64: 32, 128>}]} {
    %c0 = arith.constant 0 : index
    %c0_0 = arith.constant 0 : index
    %0 = vector.load %arg1[%c0, %c0_0] : memref<32x400xbf16, #tpu.memory_space<vmem>>, vector<32x400xbf16>
    %c0_1 = arith.constant 0 : index
    %c0_2 = arith.constant 0 : index
    %1 = vector.load %arg2[%c0_1, %c0_2] : memref<400x512xbf16, #tpu.memory_space<vmem>>, vector<400x512xbf16>
    %cst = arith.constant dense<0.000000e+00> : vector<32x512xf32>
    %2 = tpu.matmul %0, %1, %cst {dimension_numbers = #tpu.dot_dimension_numbers<[1], [0], [0], [1], [0, 0, 1, 1], [], []>} : vector<32x400xbf16>, vector<400x512xbf16>, vector<32x512xf32> -> vector<32x512xf32>
    %3 = vector.extract_strided_slice %2 {offsets = [0, 0], sizes = [32, 128], strides = [1, 1]} : vector<32x512xf32> to vector<32x128xf32>
    %4 = vector.extract_strided_slice %2 {offsets = [0, 128], sizes = [32, 128], strides = [1, 1]} : vector<32x512xf32> to vector<32x128xf32>
    %5 = arith.maximumf %3, %4 : vector<32x128xf32>
    %6 = vector.extract_strided_slice %2 {offsets = [0, 256], sizes = [32, 128], strides = [1, 1]} : vector<32x512xf32> to vector<32x128xf32>
    %7 = vector.extract_strided_slice %2 {offsets = [0, 384], sizes = [32, 128], strides = [1, 1]} : vector<32x512xf32> to vector<32x128xf32>
    %8 = arith.maximumf %6, %7 : vector<32x128xf32>
    %9 = arith.maximumf %5, %8 : vector<32x128xf32>
    %c0_3 = arith.constant 0 : index
    %c0_4 = arith.constant 0 : index
    %10 = vector.load %arg3[%c0_3, %c0_4] : memref<32x1xf32, #tpu.memory_space<vmem>>, vector<32x1xf32>
    %11 = vector.broadcast %10 : vector<32x1xf32> to vector<32x128xf32>
    %12 = arith.addf %9, %11 : vector<32x128xf32>
    %cst_5 = arith.constant 0.000000e+00 : f32
    %13 = vector.broadcast %cst_5 : f32 to vector<32x128xf32>
    %14 = arith.maximumf %12, %13 : vector<32x128xf32>
    %15 = arith.truncf %14 : vector<32x128xf32> to vector<32x128xbf16>
    %c0_6 = arith.constant 0 : index
    %c0_7 = arith.constant 0 : index
    %16 = vector.load %arg4[%c0_6, %c0_7] : memref<32x128xbf16, #tpu.memory_space<vmem>>, vector<32x128xbf16>
    tpu.vector_store %arg4[%c0_6, %c0_7], %15 {strides = array<i32>} : memref<32x128xbf16, #tpu.memory_space<vmem>>, vector<32x128xbf16>,
    return
  }
  func.func @transform_0(%arg0: i32) -> (i32, i32) {
    %c0_i32 = arith.constant 0 : i32
    %c0_i32_0 = arith.constant 0 : i32
    %c0_i32_1 = arith.constant 0 : i32
    return %c0_i32, %c0_i32_0 : i32, i32
  }
  func.func @transform_1(%arg0: i32) -> (i32, i32) {
    %c0_i32 = arith.constant 0 : i32
    %c0_i32_0 = arith.constant 0 : i32
    return %c0_i32, %arg0 : i32, i32
  }
  func.func @transform_2(%arg0: i32) -> (i32, i32) {
    %c0_i32 = arith.constant 0 : i32
    %c0_i32_0 = arith.constant 0 : i32
    %c0_i32_1 = arith.constant 0 : i32
    return %c0_i32, %c0_i32_0 : i32, i32
  }
  func.func @transform_3(%arg0: i32) -> (i32, i32) {
    %c0_i32 = arith.constant 0 : i32
    %c0_i32_0 = arith.constant 0 : i32
    return %c0_i32, %arg0 : i32, i32
  }
}

module attributes {stable_mosaic.version = 11 : i64} {
  func.func @_linear_kernel(%arg0: i32, %arg1: memref<16x512xbf16, #tpu.memory_space<vmem>>, %arg2: memref<512x128xbf16, #tpu.memory_space<vmem>>, %arg3: memref<16x1xf32, #tpu.memory_space<vmem>>, %arg4: memref<16x128xf32, #tpu.memory_space<vmem>>) attributes {dimension_semantics = [#tpu.dimension_semantics<parallel>], iteration_bounds = array<i64: 1>, scalar_prefetch = 0 : i64, scratch_operands = 0 : i64, tpu.core_type = #tpu.core_type<tc>, window_params = [{pipeline_mode = #tpu.pipeline_mode<synchronous>, transform_indices = @transform_0, window_bounds = array<i64: 16, 512>}, {transform_indices = @transform_1, window_bounds = array<i64: 512, 128>}, {pipeline_mode = #tpu.pipeline_mode<synchronous>, transform_indices = @transform_2, window_bounds = array<i64: 16, 1>}, {transform_indices = @transform_3, window_bounds = array<i64: 16, 128>}]} {
    %c0 = arith.constant 0 : index
    %c0_0 = arith.constant 0 : index
    %0 = vector.load %arg1[%c0, %c0_0] : memref<16x512xbf16, #tpu.memory_space<vmem>>, vector<16x512xbf16>
    %c0_1 = arith.constant 0 : index
    %c0_2 = arith.constant 0 : index
    %1 = vector.load %arg2[%c0_1, %c0_2] : memref<512x128xbf16, #tpu.memory_space<vmem>>, vector<512x128xbf16>
    %cst = arith.constant dense<0.000000e+00> : vector<16x128xf32>
    %2 = tpu.matmul %0, %1, %cst {dimension_numbers = #tpu.dot_dimension_numbers<[1], [0], [0], [1], [0, 0, 1, 1], [], []>} : vector<16x512xbf16>, vector<512x128xbf16>, vector<16x128xf32> -> vector<16x128xf32>
    %c0_3 = arith.constant 0 : index
    %c0_4 = arith.constant 0 : index
    %3 = vector.load %arg3[%c0_3, %c0_4] : memref<16x1xf32, #tpu.memory_space<vmem>>, vector<16x1xf32>
    %4 = vector.broadcast %3 : vector<16x1xf32> to vector<16x128xf32>
    %5 = arith.addf %2, %4 : vector<16x128xf32>
    %c0_5 = arith.constant 0 : index
    %c0_6 = arith.constant 0 : index
    %6 = vector.load %arg4[%c0_5, %c0_6] : memref<16x128xf32, #tpu.memory_space<vmem>>, vector<16x128xf32>
    tpu.vector_store %arg4[%c0_5, %c0_6], %5 {strides = array<i32>} : memref<16x128xf32, #tpu.memory_space<vmem>>, vector<16x128xf32>,
    return
  }
  func.func @transform_0(%arg0: i32) -> (i32, i32) {
    %c0_i32 = arith.constant 0 : i32
    %c0_i32_0 = arith.constant 0 : i32
    %c0_i32_1 = arith.constant 0 : i32
    return %c0_i32, %c0_i32_0 : i32, i32
  }
  func.func @transform_1(%arg0: i32) -> (i32, i32) {
    %c0_i32 = arith.constant 0 : i32
    %c0_i32_0 = arith.constant 0 : i32
    return %c0_i32, %arg0 : i32, i32
  }
  func.func @transform_2(%arg0: i32) -> (i32, i32) {
    %c0_i32 = arith.constant 0 : i32
    %c0_i32_0 = arith.constant 0 : i32
    %c0_i32_1 = arith.constant 0 : i32
    return %c0_i32, %c0_i32_0 : i32, i32
  }
  func.func @transform_3(%arg0: i32) -> (i32, i32) {
    %c0_i32 = arith.constant 0 : i32
    %c0_i32_0 = arith.constant 0 : i32
    return %c0_i32, %arg0 : i32, i32
  }
}

</mosaic_0001>

<bundles_post_ra>
// kernel: cnn_model_forward.3
= control target key start
LH: loop header
LB: loop body
LE: loop exit
PB: predicated region body
PF: predicated region fallthrough
CT: control target
= control target key end

     0   :  { %v1626_v1 = vmov 0   ;;  %vm454_vm0 = vcmask 261120   ;;  %s2128_s1 = inlined_call_operand.vmem [shape: bf16[32,4608], index: 1, kind: input, shape index: {}]   ;;  %s2129_s0 = inlined_call_operand.vmem [shape: bf16[16,32], index: 0, kind: input, shape index: {}]   ;;  %s2130_s2 = inlined_call_operand.vmem [shape: f32[16,1], index: 2, kind: input, shape index: {}]   ;;  %s2131_s3 = inlined_call_operand.vmem [shape: bf16[16,1152], index: 3, kind: output, shape index: {}]  }
   0x1   :  { %v1517_v0 = vld [vmem:[%s2128_s1 + $0x124] ss:$144 sps:$4 sm:$0xff]   ;;  %490 = vmatprep.mubr.bf16.mxu0 %v1626_v1  ;;  %533 = vmatprep.mubr.bf16.mxu1 %v1626_v1  ;;  %v1519_v2 = vld [vmem:[%s2128_s1 + $0x12c] ss:$144 sps:$4 sm:$0xff]   ;;  %v1521_v3 = vld [vmem:[%s2128_s1 + $0x120] ss:$144 sps:$4 sm:$0xff]  }
   0x2   :  { %1516 = vset.pattern.permute.xlu0 %v1626_v1  ;;  %470 = vmatprep.subr.bf16.mxu0 %v1517_v0  ;;  %v1522_v4 = vld [vmem:[%s2128_s1 + $0x128] ss:$144 sps:$4 sm:$0xff]   ;;  %v1523_v5 = vld [vmem:[%s2128_s1 + $0x4] ss:$144 sps:$4 sm:$0xff]   ;;  %v1525_v6 = vld [vmem:[%s2128_s1 + $0xc] ss:$144 sps:$4 sm:$0xff]  }
   0x3   :  { %513 = vmatprep.subr.bf16.mxu1 %v1519_v2  ;;  %471 = vmatpush1.bf16.msra.mxu0 %v1521_v3  ;;  %v1527_v7 = vld [vmem:[%s2128_s1] ss:$144 sps:$4 sm:$0xff]   ;;  %v1528_v8 = vld [vmem:[%s2128_s1 + $0x8] ss:$144 sps:$4 sm:$0xff]   ;;  %v1532_v11 = vld [vmem:[%s2128_s1 + $0x134] ss:$144 sps:$4 sm:$0xff]  }
   0x4   :  { %514 = vmatpush1.bf16.msra.mxu1 %v1522_v4  ;;  %472 = vmatprep.subr.bf16.mxu0 %v1523_v5  ;;  %v1677_v9 = vld [vmem:[%s2129_s0] sm:$0xff]   ;;  %v1533_v12 = vld [vmem:[%s2128_s1 + $0x138] ss:$144 sps:$4 sm:$0xff]   ;;  %v1535_v13 = vld [vmem:[%s2128_s1 + $0x13c] ss:$144 sps:$4 sm:$0xff]  }
   0x5   :  { %515 = vmatprep.subr.bf16.mxu1 %v1525_v6  ;;  %v1530_v10 = vld [vmem:[%s2128_s1 + $0x130] ss:$144 sps:$4 sm:$0xff]   ;;  %v1538_v14 = vld [vmem:[%s2128_s1 + $0x14] ss:$144 sps:$4 sm:$0xff]   ;;  %v1541_v15 = vld [vmem:[%s2128_s1 + $0x1c] ss:$144 sps:$4 sm:$0xff]  }
   0x6   :  { %v1536_v16 = vld [vmem:[%s2128_s1 + $0x10] ss:$144 sps:$4 sm:$0xff]   ;;  %v1539_v17 = vld [vmem:[%s2128_s1 + $0x18] ss:$144 sps:$4 sm:$0xff]   ;;  %v1544_v18 = vld [vmem:[%s2128_s1 + $0x144] ss:$144 sps:$4 sm:$0xff]  }
   0x7   :  { %473 = vmatpush1.bf16.msra.mxu0 %v1527_v7  ;;  %v1547_v19 = vld [vmem:[%s2128_s1 + $0x14c] ss:$144 sps:$4 sm:$0xff]   ;;  %v1542_v20 = vld [vmem:[%s2128_s1 + $0x140] ss:$144 sps:$4 sm:$0xff]   ;;  %v1545_v21 = vld [vmem:[%s2128_s1 + $0x148] ss:$144 sps:$4 sm:$0xff]  }
   0x8   :  { %516 = vmatpush1.bf16.msra.mxu1 %v1528_v8  ;;  %556 = vmatprep.subr.bf16.mxu0 %v1532_v11  ;;  %v1550_v22 = vld [vmem:[%s2128_s1 + $0x24] ss:$144 sps:$4 sm:$0xff]   ;;  %v1553_v23 = vld [vmem:[%s2128_s1 + $0x2c] ss:$144 sps:$4 sm:$0xff]   ;;  %v1548_v24 = vld [vmem:[%s2128_s1 + $0x20] ss:$144 sps:$4 sm:$0xff]  }
   0x9   :  { %599 = vmatprep.subr.bf16.mxu1 %v1535_v13  ;;  %v1551_v25 = vld [vmem:[%s2128_s1 + $0x28] ss:$144 sps:$4 sm:$0xff]   ;;  %v1556_v26 = vld [vmem:[%s2128_s1 + $0x154] ss:$144 sps:$4 sm:$0xff]   ;;  %v1559_v27 = vld [vmem:[%s2128_s1 + $0x15c] ss:$144 sps:$4 sm:$0xff]  }
   0xa   :  { %1477 = vmatmul.mubr.msk.bf16.vlgmr.msra.gmra.mxu0 %vm454_vm0, %v1677_v9  ;;  %v1554_v28 = vld [vmem:[%s2128_s1 + $0x150] ss:$144 sps:$4 sm:$0xff]   ;;  %v1557_v29 = vld [vmem:[%s2128_s1 + $0x158] ss:$144 sps:$4 sm:$0xff]   ;;  %v1562_v30 = vld [vmem:[%s2128_s1 + $0x34] ss:$144 sps:$4 sm:$0xff]  }
   0xb   :  { %1478 = vmatmul.mubr.msk.bf16.vlgmr.msra.gmra.mxu1 %vm454_vm0, %v1677_v9  ;;  %557 = vmatpush1.bf16.msra.mxu0 %v1530_v10  ;;  %v1565_v31 = vld [vmem:[%s2128_s1 + $0x3c] ss:$144 sps:$4 sm:$0xff]   ;;  %v1560_v32 = vld [vmem:[%s2128_s1 + $0x30] ss:$144 sps:$4 sm:$0xff]   ;;  %v1563_v33 = vld [vmem:[%s2128_s1 + $0x38] ss:$144 sps:$4 sm:$0xff]  }
   0xc   :  { %600 = vmatpush1.bf16.msra.mxu1 %v1533_v12  ;;  %558 = vmatprep.subr.bf16.mxu0 %v1538_v14  ;;  %v1568_v34 = vld [vmem:[%s2128_s1 + $0x164] ss:$144 sps:$4 sm:$0xff]   ;;  %v1571_v35 = vld [vmem:[%s2128_s1 + $0x16c] ss:$144 sps:$4 sm:$0xff]   ;;  %v1566_v36 = vld [vmem:[%s2128_s1 + $0x160] ss:$144 sps:$4 sm:$0xff]  }
   0xd   :  { %601 = vmatprep.subr.bf16.mxu1 %v1541_v15  ;;  %576 = vmatprep.mubr.bf16.mxu0 %v1626_v1  ;;  %v1569_v37 = vld [vmem:[%s2128_s1 + $0x168] ss:$144 sps:$4 sm:$0xff]   ;;  %v1574_v38 = vld [vmem:[%s2128_s1 + $0x44] ss:$144 sps:$4 sm:$0xff]   ;;  %v1577_v39 = vld [vmem:[%s2128_s1 + $0x4c] ss:$144 sps:$4 sm:$0xff]  }
   0xe   :  { %619 = vmatprep.mubr.bf16.mxu1 %v1626_v1  ;;  %v1572_v40 = vld [vmem:[%s2128_s1 + $0x40] ss:$144 sps:$4 sm:$0xff]   ;;  %v1575_v41 = vld [vmem:[%s2128_s1 + $0x48] ss:$144 sps:$4 sm:$0xff]   ;;  %v1580_v42 = vld [vmem:[%s2128_s1 + $0x174] ss:$144 sps:$4 sm:$0xff]  }
   0xf   :  { %559 = vmatpush1.bf16.msra.mxu0 %v1536_v16  ;;  %v1583_v43 = vld [vmem:[%s2128_s1 + $0x17c] ss:$144 sps:$4 sm:$0xff]   ;;  %v1578_v44 = vld [vmem:[%s2128_s1 + $0x170] ss:$144 sps:$4 sm:$0xff]   ;;  %v1581_v45 = vld [vmem:[%s2128_s1 + $0x178] ss:$144 sps:$4 sm:$0xff]  }
  0x10   :  { %602 = vmatpush1.bf16.msra.mxu1 %v1539_v17  ;;  %642 = vmatprep.subr.bf16.mxu0 %v1544_v18  ;;  %v1586_v46 = vld [vmem:[%s2128_s1 + $0x54] ss:$144 sps:$4 sm:$0xff]   ;;  %v1589_v47 = vld [vmem:[%s2128_s1 + $0x5c] ss:$144 sps:$4 sm:$0xff]   ;;  %v1584_v48 = vld [vmem:[%s2128_s1 + $0x50] ss:$144 sps:$4 sm:$0xff]  }
  0x11   :  { %685 = vmatprep.subr.bf16.mxu1 %v1547_v19  ;;  %v1587_v49 = vld [vmem:[%s2128_s1 + $0x58] ss:$144 sps:$4 sm:$0xff]   ;;  %v1592_v50 = vld [vmem:[%s2128_s1 + $0x184] ss:$144 sps:$4 sm:$0xff]   ;;  %v1595_v51 = vld [vmem:[%s2128_s1 + $0x18c] ss:$144 sps:$4 sm:$0xff]  }
  0x12   :  { %1479 = vmatmul.mubr.msk.bf16.vlgmr.msra.gmra.mxu0 %vm454_vm0, %v1677_v9  ;;  %v1590_v52 = vld [vmem:[%s2128_s1 + $0x180] ss:$144 sps:$4 sm:$0xff]   ;;  %v1593_v53 = vld [vmem:[%s2128_s1 + $0x188] ss:$144 sps:$4 sm:$0xff]   ;;  %v1598_v54 = vld [vmem:[%s2128_s1 + $0x64] ss:$144 sps:$4 sm:$0xff]  }
  0x13   :  { %1480 = vmatmul.mubr.msk.bf16.vlgmr.msra.gmra.mxu1 %vm454_vm0, %v1677_v9  ;;  %643 = vmatpush1.bf16.msra.mxu0 %v1542_v20  ;;  %v1601_v55 = vld [vmem:[%s2128_s1 + $0x6c] ss:$144 sps:$4 sm:$0xff]   ;;  %v1286_v56 = vld [vmem:[%s2130_s2] sm:$0xff]  ;;  %v1599_v58 = vld [vmem:[%s2128_s1 + $0x68] ss:$144 sps:$4 sm:$0xff]  }
  0x14   :  { %686 = vmatpush1.bf16.msra.mxu1 %v1545_v21  ;;  %644 = vmatprep.subr.bf16.mxu0 %v1550_v22  ;;  %v1596_v57 = vld [vmem:[%s2128_s1 + $0x60] ss:$144 sps:$4 sm:$0xff]   ;;  %v1287_v59 = vld [vmem:[%s2130_s2 + $0x8] sm:$0xff]  ;;  %v1604_v60 = vld [vmem:[%s2128_s1 + $0x194] ss:$144 sps:$4 sm:$0xff]  }
  0x15   :  { %687 = vmatprep.subr.bf16.mxu1 %v1553_v23  ;;  %662 = vmatprep.mubr.bf16.mxu0 %v1626_v1  ;;  %v1607_v61 = vld [vmem:[%s2128_s1 + $0x19c] ss:$144 sps:$4 sm:$0xff]   ;;  %v1602_v62 = vld [vmem:[%s2128_s1 + $0x190] ss:$144 sps:$4 sm:$0xff]   ;;  %v1605_v63 = vld [vmem:[%s2128_s1 + $0x198] ss:$144 sps:$4 sm:$0xff]  }
  0x16   :  { %705 = vmatprep.mubr.bf16.mxu1 %v1626_v1  ;;  %1290 = vperm.xlu0 %1516, %v1286_v56   ;;  %v1610_v0 = vld [vmem:[%s2128_s1 + $0x74] ss:$144 sps:$4 sm:$0xff]   ;;  %v1613_v2 = vld [vmem:[%s2128_s1 + $0x7c] ss:$144 sps:$4 sm:$0xff]   ;;  %v1608_v3 = vld [vmem:[%s2128_s1 + $0x70] ss:$144 sps:$4 sm:$0xff]  }
  0x17   :  { %645 = vmatpush1.bf16.msra.mxu0 %v1548_v24  ;;  %v1611_v4 = vld [vmem:[%s2128_s1 + $0x78] ss:$144 sps:$4 sm:$0xff]   ;;  %v1616_v5 = vld [vmem:[%s2128_s1 + $0x1a4] ss:$144 sps:$4 sm:$0xff]   ;;  %v1619_v6 = vld [vmem:[%s2128_s1 + $0x1ac] ss:$144 sps:$4 sm:$0xff]  }
  0x18   :  { %688 = vmatpush1.bf16.msra.mxu1 %v1551_v25  ;;  %728 = vmatprep.subr.bf16.mxu0 %v1556_v26  ;;  %v1614_v7 = vld [vmem:[%s2128_s1 + $0x1a0] ss:$144 sps:$4 sm:$0xff]   ;;  %v1617_v8 = vld [vmem:[%s2128_s1 + $0x1a8] ss:$144 sps:$4 sm:$0xff]   ;;  %v1622_v10 = vld [vmem:[%s2128_s1 + $0x84] ss:$144 sps:$4 sm:$0xff]  }
  0x19   :  { %771 = vmatprep.subr.bf16.mxu1 %v1559_v27  ;;  %v1625_v11 = vld [vmem:[%s2128_s1 + $0x8c] ss:$144 sps:$4 sm:$0xff]   ;;  %v1620_v12 = vld [vmem:[%s2128_s1 + $0x80] ss:$144 sps:$4 sm:$0xff]   ;;  %v1623_v13 = vld [vmem:[%s2128_s1 + $0x88] ss:$144 sps:$4 sm:$0xff]  }
  0x1a   :  { %1481 = vmatmul.mubr.msk.bf16.vlgmr.msra.gmra.mxu0 %vm454_vm0, %v1677_v9  ;;  %1295 = vperm.xlu0 %1516, %v1287_v59  }
  0x1b   :  { %1482 = vmatmul.mubr.msk.bf16.vlgmr.msra.gmra.mxu1 %vm454_vm0, %v1677_v9  ;;  %729 = vmatpush1.bf16.msra.mxu0 %v1554_v28 }
  0x1c   :  { %772 = vmatpush1.bf16.msra.mxu1 %v1557_v29  ;;  %730 = vmatprep.subr.bf16.mxu0 %v1562_v30 }
  0x1d   :  { %773 = vmatprep.subr.bf16.mxu1 %v1565_v31  ;;  %748 = vmatprep.mubr.bf16.mxu0 %v1626_v1 }
  0x1e   :  { %791 = vmatprep.mubr.bf16.mxu1 %v1626_v1 }
  0x1f   :  { %731 = vmatpush1.bf16.msra.mxu0 %v1560_v32 }
  0x20   :  { %774 = vmatpush1.bf16.msra.mxu1 %v1563_v33  ;;  %814 = vmatprep.subr.bf16.mxu0 %v1568_v34 }
  0x21   :  { %857 = vmatprep.subr.bf16.mxu1 %v1571_v35 }
  0x22   :  { %1483 = vmatmul.mubr.msk.bf16.vlgmr.msra.gmra.mxu0 %vm454_vm0, %v1677_v9 }
  0x23   :  { %1484 = vmatmul.mubr.msk.bf16.vlgmr.msra.gmra.mxu1 %vm454_vm0, %v1677_v9  ;;  %815 = vmatpush1.bf16.msra.mxu0 %v1566_v36 }
  0x24   :  { %858 = vmatpush1.bf16.msra.mxu1 %v1569_v37  ;;  %816 = vmatprep.subr.bf16.mxu0 %v1574_v38 }
  0x25   :  { %859 = vmatprep.subr.bf16.mxu1 %v1577_v39  ;;  %834 = vmatprep.mubr.bf16.mxu0 %v1626_v1 }
  0x26   :  { %877 = vmatprep.mubr.bf16.mxu1 %v1626_v1 }
  0x27   :  { %817 = vmatpush1.bf16.msra.mxu0 %v1572_v40 }
  0x28   :  { %860 = vmatpush1.bf16.msra.mxu1 %v1575_v41  ;;  %900 = vmatprep.subr.bf16.mxu0 %v1580_v42 }
  0x29   :  { %943 = vmatprep.subr.bf16.mxu1 %v1583_v43 }
  0x2a   :  { %1485 = vmatmul.mubr.msk.bf16.vlgmr.msra.gmra.mxu0 %vm454_vm0, %v1677_v9 }
  0x2b   :  { %1486 = vmatmul.mubr.msk.bf16.vlgmr.msra.gmra.mxu1 %vm454_vm0, %v1677_v9  ;;  %901 = vmatpush1.bf16.msra.mxu0 %v1578_v44 }
  0x2c   :  { %944 = vmatpush1.bf16.msra.mxu1 %v1581_v45  ;;  %902 = vmatprep.subr.bf16.mxu0 %v1586_v46 }
  0x2d   :  { %945 = vmatprep.subr.bf16.mxu1 %v1589_v47  ;;  %920 = vmatprep.mubr.bf16.mxu0 %v1626_v1 }
  0x2e   :  { %963 = vmatprep.mubr.bf16.mxu1 %v1626_v1 }
  0x2f   :  { %903 = vmatpush1.bf16.msra.mxu0 %v1584_v48 }
  0x30   :  { %946 = vmatpush1.bf16.msra.mxu1 %v1587_v49  ;;  %986 = vmatprep.subr.bf16.mxu0 %v1592_v50 }
  0x31   :  { %1029 = vmatprep.subr.bf16.mxu1 %v1595_v51 }
  0x32   :  { %1487 = vmatmul.mubr.msk.bf16.vlgmr.msra.gmra.mxu0 %vm454_vm0, %v1677_v9 }
  0x33   :  { %1488 = vmatmul.mubr.msk.bf16.vlgmr.msra.gmra.mxu1 %vm454_vm0, %v1677_v9  ;;  %987 = vmatpush1.bf16.msra.mxu0 %v1590_v52 }
  0x34   :  { %1030 = vmatpush1.bf16.msra.mxu1 %v1593_v53  ;;  %988 = vmatprep.subr.bf16.mxu0 %v1598_v54 }
  0x35   :  { %1031 = vmatprep.subr.bf16.mxu1 %v1601_v55  ;;  %1006 = vmatprep.mubr.bf16.mxu0 %v1626_v1 }
  0x36   :  { %1049 = vmatprep.mubr.bf16.mxu1 %v1626_v1 }
  0x37   :  { %989 = vmatpush1.bf16.msra.mxu0 %v1596_v57 }
  0x38   :  { %1032 = vmatpush1.bf16.msra.mxu1 %v1599_v58  ;;  %1072 = vmatprep.subr.bf16.mxu0 %v1604_v60 }
  0x39   :  { %1115 = vmatprep.subr.bf16.mxu1 %v1607_v61 }
  0x3a   :  { %1489 = vmatmul.mubr.msk.bf16.vlgmr.msra.gmra.mxu0 %vm454_vm0, %v1677_v9 }
  0x3b   :  { %1490 = vmatmul.mubr.msk.bf16.vlgmr.msra.gmra.mxu1 %vm454_vm0, %v1677_v9  ;;  %1073 = vmatpush1.bf16.msra.mxu0 %v1602_v62 }
  0x3c   :  { %1116 = vmatpush1.bf16.msra.mxu1 %v1605_v63  ;;  %1074 = vmatprep.subr.bf16.mxu0 %v1610_v0 }
  0x3d   :  { %1117 = vmatprep.subr.bf16.mxu1 %v1613_v2  ;;  %1092 = vmatprep.mubr.bf16.mxu0 %v1626_v1 }
  0x3e   :  { %1135 = vmatprep.mubr.bf16.mxu1 %v1626_v1 }
  0x3f   :  { %1075 = vmatpush1.bf16.msra.mxu0 %v1608_v3 }
  0x40   :  { %1118 = vmatpush1.bf16.msra.mxu1 %v1611_v4  ;;  %1158 = vmatprep.subr.bf16.mxu0 %v1616_v5 }
  0x41   :  { %1201 = vmatprep.subr.bf16.mxu1 %v1619_v6 }
  0x42   :  { %1491 = vmatmul.mubr.msk.bf16.vlgmr.msra.gmra.mxu0 %vm454_vm0, %v1677_v9 }
  0x43   :  { %1492 = vmatmul.mubr.msk.bf16.vlgmr.msra.gmra.mxu1 %vm454_vm0, %v1677_v9  ;;  %1159 = vmatpush1.bf16.msra.mxu0 %v1614_v7 }
  0x44   :  { %1202 = vmatpush1.bf16.msra.mxu1 %v1617_v8  ;;  %1160 = vmatprep.subr.bf16.mxu0 %v1622_v10 }
  0x45   :  { %1203 = vmatprep.subr.bf16.mxu1 %v1625_v11  ;;  %1178 = vmatprep.mubr.bf16.mxu0 %v1626_v1 }
  0x46   :  { %1221 = vmatprep.mubr.bf16.mxu1 %v1626_v1 }
  0x47   :  { %1161 = vmatpush1.bf16.msra.mxu0 %v1620_v12 }
  0x48   :  { %1204 = vmatpush1.bf16.msra.mxu1 %v1623_v13 }
  0x4a   :  { %1493 = vmatmul.mubr.msk.bf16.vlgmr.msra.gmra.mxu0 %vm454_vm0, %v1677_v9 }
  0x4b   :  { %1494 = vmatmul.mubr.msk.bf16.vlgmr.msra.gmra.mxu1 %vm454_vm0, %v1677_v9 }
  0x91   :  { %v2011_v2 = vpop.permute.xlu0 %1290 }
  0xca   :  { %v492_v14 = vpop.f32.mrf.mxu0 }
  0xcb   :  { %v1929_v15 = vpop.f32.mrf.mxu1 }
  0xcc   :  { %v1931_v16 = vpop.f32.mrf.mxu0 }
  0xcd   :  { %v1933_v17 = vpop.f32.mrf.mxu1 }
  0xce   :  { %v1935_v18 = vpop.f32.mrf.mxu0 }
  0xcf   :  { %v1937_v19 = vpop.f32.mrf.mxu1 }
  0xd0   :  { %v1939_v1 = vpop.f32.mrf.mxu0 }
  0xd1   :  { %v1941_v20 = vpop.f32.mrf.mxu1 }
  0xd2   :  { %v1943_v21 = vpop.f32.mrf.mxu0 }
  0xd3   :  { %v1945_v22 = vpop.f32.mrf.mxu1 }
  0xd4   :  { %v1947_v9 = vpop.f32.mrf.mxu0 }
  0xd5   :  { %v1949_v23 = vpop.f32.mrf.mxu1 }
  0xd6   :  { %v1951_v24 = vpop.f32.mrf.mxu0 }
  0xd7   :  { %v1953_v25 = vpop.f32.mrf.mxu1 }
  0xd8   :  { %v1955_v26 = vpop.f32.mrf.mxu0 }
  0xd9   :  { %v1957_v27 = vpop.f32.mrf.mxu1 }
  0xda   :  { %v1959_v28 = vpop.f32.mrf.mxu0 }
  0xdb   :  { %v1961_v29 = vpop.f32.mrf.mxu1 }
  0xdc   :  { %v666_v30 = vpop.f32.mrf.mxu0  ;;  %v1233_v6 = vmax.f32 %v1931_v16, %v1961_v29 }
  0xdd   :  { %v1963_v31 = vpop.f32.mrf.mxu1  ;;  %v1232_v3 = vmax.f32 %v492_v14, %v666_v30 }
  0xde   :  { %v1965_v32 = vpop.f32.mrf.mxu0  ;;  %v1234_v7 = vmax.f32 %v1929_v15, %v1963_v31 }
  0xdf   :  { %v1967_v33 = vpop.f32.mrf.mxu1 }
  0xe0   :  { %v670_v34 = vpop.f32.mrf.mxu0  ;;  %v1242_v12 = vmax.f32 %v1939_v1, %v1967_v33 }
  0xe1   :  { %v1969_v35 = vpop.f32.mrf.mxu1  ;;  %v1241_v13 = vmax.f32 %v1935_v18, %v670_v34  ;;  %v2037_v34 = vpop.permute.xlu0 %1295 }
  0xe2   :  { %v750_v36 = vpop.f32.mrf.mxu0  ;;  %v1243_v14 = vmax.f32 %v1937_v19, %v1969_v35 }
  0xe3   :  { %v1971_v37 = vpop.f32.mrf.mxu1 }
  0xe4   :  { %v1973_v38 = vpop.f32.mrf.mxu0  ;;  %v1237_v16 = vmax.f32 %v1947_v9, %v1971_v37 }
  0xe5   :  { %v1975_v39 = vpop.f32.mrf.mxu1  ;;  %v1236_v15 = vmax.f32 %v1943_v21, %v1973_v38 }
  0xe6   :  { %v1977_v40 = vpop.f32.mrf.mxu0  ;;  %v1238_v29 = vmax.f32 %v1945_v22, %v1975_v39 }
  0xe7   :  { %v1979_v41 = vpop.f32.mrf.mxu1  ;;  %v1244_v18 = vmax.f32 %v1941_v20, %v1977_v40 }
  0xe8   :  { %v1981_v42 = vpop.f32.mrf.mxu0 }
  0xe9   :  { %v1983_v43 = vpop.f32.mrf.mxu1  ;;  %v1245_v9 = vmax.f32 %v1951_v24, %v1981_v42 }
  0xea   :  { %v1985_v44 = vpop.f32.mrf.mxu0  ;;  %v1247_v21 = vmax.f32 %v1953_v25, %v1983_v43 }
  0xeb   :  { %v879_v45 = vpop.f32.mrf.mxu1 }
  0xec   :  { %v1987_v46 = vpop.f32.mrf.mxu0 }
  0xed   :  { %v881_v47 = vpop.f32.mrf.mxu1 }
  0xee   :  { %v1989_v48 = vpop.f32.mrf.mxu0 }
  0xef   :  { %v883_v49 = vpop.f32.mrf.mxu1  ;;  %v1248_v24 = vmax.f32 %v1957_v27, %v1989_v48 }
  0xf0   :  { %v1991_v50 = vpop.f32.mrf.mxu0 }
  0xf1   :  { %v1993_v51 = vpop.f32.mrf.mxu1 }
  0xf2   :  { %v922_v52 = vpop.f32.mrf.mxu0 }
  0xf3   :  { %v965_v53 = vpop.f32.mrf.mxu1 }
  0xf4   :  { %v924_v54 = vpop.f32.mrf.mxu0 }
  0xf5   :  { %v1995_v55 = vpop.f32.mrf.mxu1 }
  0xf6   :  { %v1997_v56 = vpop.f32.mrf.mxu0 }
  0xf7   :  { %v1999_v57 = vpop.f32.mrf.mxu1 }
  0xf8   :  { %v2001_v58 = vpop.f32.mrf.mxu0 }
  0xf9   :  { %v2003_v59 = vpop.f32.mrf.mxu1 }
  0xfa   :  { %v2005_v60 = vpop.f32.mrf.mxu0 }
  0xfb   :  { %v2007_v61 = vpop.f32.mrf.mxu1 }
  0xfc   :  { %v2009_v62 = vpop.f32.mrf.mxu0 }
  0xfd   :  { %v1053_v63 = vpop.f32.mrf.mxu1 }
  0xfe   :  { %v1250_v0 = vmax.f32 %v879_v45, %v1053_v63  ;;  %v2013_v4 = vpop.f32.mrf.mxu0  ;;  %v1235_v45 = vmax.f32 %v1933_v17, %v750_v36  ;;  %v1246_v17 = vmax.f32 %v1955_v26, %v1979_v41 }
  0xff   :  { %v2015_v5 = vpop.f32.mrf.mxu1 }
 0x100   :  { %v1268_v8 = vmax.f32 %v1232_v3, %v1250_v0  ;;  %v2021_v10 = vpop.f32.mrf.mxu0 }
 0x101   :  { %v1057_v11 = vpop.f32.mrf.mxu1 }
 0x102   :  { %v1259_v30 = vmax.f32 %v883_v49, %v1057_v11  ;;  %v1094_v31 = vpop.f32.mrf.mxu0  ;;  %v1298_v35 = vadd.f32 %v2011_v2, %v1268_v8  ;;  %v1239_v49 = vmax.f32 %v1949_v23, %v1985_v44 }
 0x103   :  { %v1137_v63 = vpop.f32.mrf.mxu1  ;;  %v1251_v33 = vmax.f32 %v881_v47, %v1094_v31 }
 0x104   :  { %v1277_v1 = vmax.f32 %v1241_v13, %v1259_v30  ;;  %v1253_v19 = vmax.f32 %v924_v54, %v1137_v63  ;;  %v1096_v36 = vpop.f32.mrf.mxu0  ;;  %v1240_v54 = vmax.f32 %v1959_v28, %v1987_v46  ;;  %v1316_v23 = vmax.f32 %v1298_v35, 0.0 }
 0x105   :  { %v1139_v37 = vpop.f32.mrf.mxu1  ;;  %v1269_v38 = vmax.f32 %v1233_v6, %v1251_v33  ;;  %v1252_v40 = vmax.f32 %v922_v52, %v1096_v36 }
 0x106   :  { %v1271_v20 = vmax.f32 %v1235_v45, %v1253_v19  ;;  %v1254_v47 = vmax.f32 %v965_v53, %v1139_v37  ;;  %v1098_v42 = vpop.f32.mrf.mxu0  ;;  %v1307_v0 = vadd.f32 %v2037_v34, %v1277_v1  ;;  %v1249_v53 = vmax.f32 %v1965_v32, %v1991_v50 }
 0x107   :  { %v1141_v3 = vpop.f32.mrf.mxu1  ;;  %v1299_v8 = vadd.f32 %v2011_v2, %v1269_v38  ;;  %v1270_v11 = vmax.f32 %v1234_v7, %v1252_v40  ;;  %v1260_v44 = vmax.f32 %v1993_v51, %v1098_v42 }
 0x108   :  { %v1301_v6 = vadd.f32 %v2011_v2, %v1271_v20  ;;  %v1272_v52 = vmax.f32 %v1236_v15, %v1254_v47  ;;  %v1262_v28 = vmax.f32 %v2001_v58, %v1141_v3  ;;  %v1100_v46 = vpop.f32.mrf.mxu0  ;;  %v1325_v63 = vmax.f32 %v1307_v0, 0.0 }
 0x109   :  { %v1143_v13 = vpop.f32.mrf.mxu1  ;;  %v1317_v30 = vmax.f32 %v1299_v8, 0.0  ;;  %v1300_v45 = vadd.f32 %v2011_v2, %v1270_v11  ;;  %v1278_v1 = vmax.f32 %v1242_v12, %v1260_v44  ;;  %v1261_v7 = vmax.f32 %v1997_v56, %v1100_v46 }
 0x10a   :  { %v1302_v31 = vadd.f32 %v2011_v2, %v1272_v52  ;;  %v1280_v33 = vmax.f32 %v1244_v18, %v1262_v28  ;;  %v1263_v15 = vmax.f32 %v1999_v57, %v1143_v13  ;;  %v1180_v19 = vpop.f32.mrf.mxu0  ;;  %v1319_v51 = vmax.f32 %v1301_v6, 0.0 }
 0x10b   :  { %v1223_v35 = vpop.f32.mrf.mxu1  ;;  %v1505_v36 = vpack.c.bf16 %v1317_v30, %v1316_v23  ;;  %v1318_v37 = vmax.f32 %v1300_v45, 0.0  ;;  %v1255_v58 = vmax.f32 %v1995_v55, %v1180_v19  ;;  %v1308_v38 = vadd.f32 %v2037_v34, %v1278_v1 }
 0x10c   :  { %v1310_v20 = vadd.f32 %v2037_v34, %v1280_v33  ;;  %v1279_v40 = vmax.f32 %v1243_v14, %v1261_v7  ;;  %v1281_v47 = vmax.f32 %v1245_v9, %v1263_v15  ;;  %v1182_v42 = vpop.f32.mrf.mxu0  ;;  %v1257_v18 = vmax.f32 %v2009_v62, %v1223_v35 }
 0x10d   :  { %v1225_v12 = vpop.f32.mrf.mxu1  ;;  %1390 = vst [vmem:[%s2131_s3] sm:$0xff] %v1505_v36  ;;  %v1506_v56 = vpack.c.bf16 %v1319_v51, %v1318_v37  ;;  %v1273_v57 = vmax.f32 %v1237_v16, %v1255_v58  ;;  %v1256_v0 = vmax.f32 %v2005_v60, %v1182_v42  ;;  %v1320_v3 = vmax.f32 %v1302_v31, 0.0 }
 0x10e   :  { %v1326_v55 = vmax.f32 %v1308_v38, 0.0  ;;  %v1328_v8 = vmax.f32 %v1310_v20, 0.0  ;;  %v1309_v6 = vadd.f32 %v2037_v34, %v1279_v40  ;;  %v1184_v11 = vpop.f32.mrf.mxu0  ;;  %v1275_v52 = vmax.f32 %v1239_v49, %v1257_v18 }
 0x10f   :  { %v1227_v14 = vpop.f32.mrf.mxu1  ;;  %1391 = vst [vmem:[%s2131_s3 + $0x8] sm:$0xff] %v1506_v56  ;;  %v1303_v9 = vadd.f32 %v2011_v2, %v1273_v57  ;;  %v1274_v62 = vmax.f32 %v1238_v29, %v1256_v0  ;;  %v1258_v60 = vmax.f32 %v2007_v61, %v1225_v12  ;;  %v1311_v44 = vadd.f32 %v2037_v34, %v1281_v47 }
 0x110   :  { %v1510_v16 = vpack.c.bf16 %v1326_v55, %v1325_v63  ;;  %v1327_v23 = vmax.f32 %v1309_v6, 0.0  ;;  %v1264_v28 = vmax.f32 %v2003_v59, %v1184_v11  ;;  %v1186_v46 = vpop.f32.mrf.mxu0  ;;  %v1305_v30 = vadd.f32 %v2011_v2, %v1275_v52 }
 0x111   :  { %v1321_v13 = vmax.f32 %v1303_v9, 0.0  ;;  %v1304_v45 = vadd.f32 %v2011_v2, %v1274_v62  ;;  %v1276_v31 = vmax.f32 %v1240_v54, %v1258_v60  ;;  %v1229_v49 = vpop.f32.mrf.mxu1  ;;  %v1266_v61 = vmax.f32 %v2021_v10, %v1227_v14 }
 0x112   :  { %1395 = vst [vmem:[%s2131_s3 + $0x24] sm:$0xff] %v1510_v16  ;;  %v1511_v22 = vpack.c.bf16 %v1328_v8, %v1327_v23  ;;  %v1282_v39 = vmax.f32 %v1246_v17, %v1264_v28  ;;  %v1265_v59 = vmax.f32 %v2013_v4, %v1186_v46  ;;  %v1323_v63 = vmax.f32 %v1305_v30, 0.0 }
 0x113   :  { %v1507_v29 = vpack.c.bf16 %v1321_v13, %v1320_v3  ;;  %v1322_v1 = vmax.f32 %v1304_v45, 0.0  ;;  %v1306_v33 = vadd.f32 %v2011_v2, %v1276_v31  ;;  %v1284_v26 = vmax.f32 %v1248_v24, %v1266_v61 }
 0x114   :  { %1396 = vst [vmem:[%s2131_s3 + $0x2c] sm:$0xff] %v1511_v22  ;;  %v1312_v54 = vadd.f32 %v2037_v34, %v1282_v39  ;;  %v1283_v41 = vmax.f32 %v1247_v21, %v1265_v59  ;;  %v1267_v4 = vmax.f32 %v2015_v5, %v1229_v49  ;;  %v1329_v10 = vmax.f32 %v1311_v44, 0.0 }
 0x115   :  { %1392 = vst [vmem:[%s2131_s3 + $0x10] sm:$0xff] %v1507_v29  ;;  %v1508_v2 = vpack.c.bf16 %v1323_v63, %v1322_v1  ;;  %v1324_v17 = vmax.f32 %v1306_v33, 0.0  ;;  %v1314_v15 = vadd.f32 %v2037_v34, %v1284_v26 }
 0x116   :  { %v1330_v7 = vmax.f32 %v1312_v54, 0.0  ;;  %v1313_v19 = vadd.f32 %v2037_v34, %v1283_v41  ;;  %v1285_v27 = vmax.f32 %v1249_v53, %v1267_v4 }
 0x117   :  { %1393 = vst [vmem:[%s2131_s3 + $0x18] sm:$0xff] %v1508_v2  ;;  %v1509_v25 = vpack.c.bf16 %v1324_v17, %v1324_v17  ;;  %v1332_v48 = vmax.f32 %v1314_v15, 0.0 }
 0x118   :  { %v1512_v43 = vpack.c.bf16 %v1330_v7, %v1329_v10  ;;  %v1331_v5 = vmax.f32 %v1313_v19, 0.0  ;;  %v1315_v21 = vadd.f32 %v2037_v34, %v1285_v27 }
 0x119   :  { %1394 = vst [vmem:[%s2131_s3 + $0x20] sm:$0xf] %v1509_v25 }
 0x11a   :  { %1397 = vst [vmem:[%s2131_s3 + $0x34] sm:$0xff] %v1512_v43  ;;  %v1513_v32 = vpack.c.bf16 %v1332_v48, %v1331_v5  ;;  %v1333_v50 = vmax.f32 %v1315_v21, 0.0 }
 0x11c   :  { %1398 = vst [vmem:[%s2131_s3 + $0x3c] sm:$0xff] %v1513_v32  ;;  %v1514_v24 = vpack.c.bf16 %v1333_v50, %v1333_v50 }
 0x11e   :  { %1399 = vst [vmem:[%s2131_s3 + $0x44] sm:$0xf] %v1514_v24 }

// kernel: cnn_model_forward.4
= control target key start
LH: loop header
LB: loop body
LE: loop exit
PB: predicated region body
PF: predicated region fallthrough
CT: control target
= control target key end

     0   :  { %v1244_v1 = vmov 0   ;;  %vm661_vm0 = vcmask 130048   ;;  %s1639_s1 = inlined_call_operand.vmem [shape: bf16[400,512], index: 1, kind: input, shape index: {}]   ;;  %s1640_s0 = inlined_call_operand.vmem [shape: bf16[32,400], index: 0, kind: input, shape index: {}]   ;;  %s1641_s2 = inlined_call_operand.vmem [shape: f32[32,1], index: 2, kind: input, shape index: {}]   ;;  %s1642_s3 = inlined_call_operand.vmem [shape: bf16[32,128], index: 3, kind: output, shape index: {}]  }
   0x1   :  { %v1082_v0 = vld [vmem:[%s1639_s1 + $0xe4] ss:$16 sps:$4 sm:$0xff]   ;;  %1080 = vset.pattern.permute.xlu0 %v1244_v1  ;;  %1081 = vset.pattern.permute.xlu1 %v1244_v1  ;;  %v1086_v3 = vld [vmem:[%s1639_s1 + $0xe0] ss:$16 sps:$4 sm:$0xff]   ;;  %v1358_v31 = vld [vmem:[%s1640_s0 + $0xc] ss:$16 sps:$4 sm:$0xff]  }
   0x2   :  { %v1084_v2 = vld [vmem:[%s1639_s1 + $0x2e4] ss:$16 sps:$4 sm:$0xff]   ;;  %668 = vmatprep.subr.bf16.mxu0 %v1082_v0  ;;  %v1087_v4 = vld [vmem:[%s1639_s1 + $0x2e0] ss:$16 sps:$4 sm:$0xff]   ;;  %1056 = vmatprep.mubr.msk.bf16.mxu1 %vm661_vm0, %v1358_v31  ;;  %v1143_v39 = vld [vmem:[%s1639_s1 + $0xec] ss:$16 sps:$4 sm:$0xff]  }
   0x3   :  { %721 = vmatprep.subr.bf16.mxu1 %v1084_v2  ;;  %v1088_v5 = vld [vmem:[%s1639_s1 + $0xc4] ss:$16 sps:$4 sm:$0xff]   ;;  %669 = vmatpush1.bf16.msra.mxu0 %v1086_v3  ;;  %v1092_v7 = vld [vmem:[%s1639_s1 + $0xc0] ss:$16 sps:$4 sm:$0xff]   ;;  %v1389_v40 = vld [vmem:[%s1640_s0 + $0x8] ss:$16 sps:$4 sm:$0xff]  }
   0x4   :  { %722 = vmatpush1.bf16.msra.mxu1 %v1087_v4  ;;  %v1090_v6 = vld [vmem:[%s1639_s1 + $0x2c4] ss:$16 sps:$4 sm:$0xff]   ;;  %670 = vmatprep.subr.bf16.mxu0 %v1088_v5  ;;  %v1093_v8 = vld [vmem:[%s1639_s1 + $0x2c0] ss:$16 sps:$4 sm:$0xff]   ;;  %v1141_v41 = vld [vmem:[%s1639_s1 + $0xe8] ss:$16 sps:$4 sm:$0xff]  }
   0x5   :  { %723 = vmatprep.subr.bf16.mxu1 %v1090_v6  ;;  %v1094_v9 = vld [vmem:[%s1639_s1 + $0xa4] ss:$16 sps:$4 sm:$0xff]   ;;  %v1098_v11 = vld [vmem:[%s1639_s1 + $0xa0] ss:$16 sps:$4 sm:$0xff]   ;;  %v1149_v44 = vld [vmem:[%s1639_s1 + $0xcc] ss:$16 sps:$4 sm:$0xff]  }
   0x6   :  { %v1096_v10 = vld [vmem:[%s1639_s1 + $0x2a4] ss:$16 sps:$4 sm:$0xff]   ;;  %v1099_v12 = vld [vmem:[%s1639_s1 + $0x2a0] ss:$16 sps:$4 sm:$0xff]   ;;  %v1147_v45 = vld [vmem:[%s1639_s1 + $0xc8] ss:$16 sps:$4 sm:$0xff]  }
   0x7   :  { %671 = vmatpush1.bf16.msra.mxu0 %v1092_v7  ;;  %v1100_v13 = vld [vmem:[%s1639_s1 + $0x84] ss:$16 sps:$4 sm:$0xff]   ;;  %v1104_v15 = vld [vmem:[%s1639_s1 + $0x80] ss:$16 sps:$4 sm:$0xff]   ;;  %v1155_v48 = vld [vmem:[%s1639_s1 + $0xac] ss:$16 sps:$4 sm:$0xff]  }
   0x8   :  { %724 = vmatpush1.bf16.msra.mxu1 %v1093_v8  ;;  %672 = vmatprep.subr.bf16.mxu0 %v1094_v9  ;;  %v1102_v14 = vld [vmem:[%s1639_s1 + $0x284] ss:$16 sps:$4 sm:$0xff]   ;;  %v1105_v16 = vld [vmem:[%s1639_s1 + $0x280] ss:$16 sps:$4 sm:$0xff]   ;;  %v1153_v49 = vld [vmem:[%s1639_s1 + $0xa8] ss:$16 sps:$4 sm:$0xff]  }
   0x9   :  { %725 = vmatprep.subr.bf16.mxu1 %v1096_v10  ;;  %v1106_v17 = vld [vmem:[%s1639_s1 + $0x64] ss:$16 sps:$4 sm:$0xff]   ;;  %v1110_v19 = vld [vmem:[%s1639_s1 + $0x60] ss:$16 sps:$4 sm:$0xff]   ;;  %v1161_v52 = vld [vmem:[%s1639_s1 + $0x8c] ss:$16 sps:$4 sm:$0xff]  }
   0xa   :  { %v1108_v18 = vld [vmem:[%s1639_s1 + $0x264] ss:$16 sps:$4 sm:$0xff]   ;;  %v1111_v20 = vld [vmem:[%s1639_s1 + $0x260] ss:$16 sps:$4 sm:$0xff]   ;;  %v1159_v54 = vld [vmem:[%s1639_s1 + $0x88] ss:$16 sps:$4 sm:$0xff]  }
   0xb   :  { %673 = vmatpush1.bf16.msra.mxu0 %v1098_v11  ;;  %v1112_v21 = vld [vmem:[%s1639_s1 + $0x44] ss:$16 sps:$4 sm:$0xff]   ;;  %v1116_v23 = vld [vmem:[%s1639_s1 + $0x40] ss:$16 sps:$4 sm:$0xff]   ;;  %v1167_v57 = vld [vmem:[%s1639_s1 + $0x6c] ss:$16 sps:$4 sm:$0xff]  }
   0xc   :  { %726 = vmatpush1.bf16.msra.mxu1 %v1099_v12  ;;  %674 = vmatprep.subr.bf16.mxu0 %v1100_v13  ;;  %v1114_v22 = vld [vmem:[%s1639_s1 + $0x244] ss:$16 sps:$4 sm:$0xff]   ;;  %v1117_v24 = vld [vmem:[%s1639_s1 + $0x240] ss:$16 sps:$4 sm:$0xff]   ;;  %v1165_v58 = vld [vmem:[%s1639_s1 + $0x68] ss:$16 sps:$4 sm:$0xff]  }
   0xd   :  { %727 = vmatprep.subr.bf16.mxu1 %v1102_v14  ;;  %v1118_v25 = vld [vmem:[%s1639_s1 + $0x24] ss:$16 sps:$4 sm:$0xff]   ;;  %v1122_v27 = vld [vmem:[%s1639_s1 + $0x20] ss:$16 sps:$4 sm:$0xff]   ;;  %v1173_v61 = vld [vmem:[%s1639_s1 + $0x4c] ss:$16 sps:$4 sm:$0xff]  }
   0xe   :  { %v1120_v26 = vld [vmem:[%s1639_s1 + $0x224] ss:$16 sps:$4 sm:$0xff]   ;;  %v1123_v28 = vld [vmem:[%s1639_s1 + $0x220] ss:$16 sps:$4 sm:$0xff]   ;;  %v1171_v62 = vld [vmem:[%s1639_s1 + $0x48] ss:$16 sps:$4 sm:$0xff]  }
   0xf   :  { %675 = vmatpush1.bf16.msra.mxu0 %v1104_v15  ;;  %v1124_v29 = vld [vmem:[%s1639_s1 + $0x4] ss:$16 sps:$4 sm:$0xff]   ;;  %v1128_v32 = vld [vmem:[%s1639_s1] ss:$16 sps:$4 sm:$0xff]   ;;  %v1179_v1 = vld [vmem:[%s1639_s1 + $0x2c] ss:$16 sps:$4 sm:$0xff]  }
  0x10   :  { %728 = vmatpush1.bf16.msra.mxu1 %v1105_v16  ;;  %676 = vmatprep.subr.bf16.mxu0 %v1106_v17  ;;  %v1126_v30 = vld [vmem:[%s1639_s1 + $0x204] ss:$16 sps:$4 sm:$0xff]   ;;  %v1129_v33 = vld [vmem:[%s1639_s1 + $0x200] ss:$16 sps:$4 sm:$0xff]   ;;  %v1177_v2 = vld [vmem:[%s1639_s1 + $0x28] ss:$16 sps:$4 sm:$0xff]  }
  0x11   :  { %729 = vmatprep.subr.bf16.mxu1 %v1108_v18  ;;  %v1130_v34 = vld [vmem:[%s1639_s1 + $0x1e4] ss:$16 sps:$4 sm:$0xff]   ;;  %v1134_v36 = vld [vmem:[%s1639_s1 + $0x1e0] ss:$16 sps:$4 sm:$0xff]   ;;  %v1186_v4 = vld [vmem:[%s1639_s1 + $0xc] ss:$16 sps:$4 sm:$0xff]  }
  0x12   :  { %v1132_v35 = vld [vmem:[%s1639_s1 + $0x304] ss:$16 sps:$4 sm:$0xff]   ;;  %v1135_v37 = vld [vmem:[%s1639_s1 + $0x300] ss:$16 sps:$4 sm:$0xff]   ;;  %v1189_v6 = vld [vmem:[%s1639_s1 + $0x2ec] ss:$16 sps:$4 sm:$0xff]  }
  0x13   :  { %677 = vmatpush1.bf16.msra.mxu0 %v1110_v19  ;;  %v1139_v38 = vld [vmem:[%s1639_s1 + $0x1c4] ss:$16 sps:$4 sm:$0xff]   ;;  %v1144_v42 = vld [vmem:[%s1639_s1 + $0x1c0] ss:$16 sps:$4 sm:$0xff]   ;;  %v1184_v7 = vld [vmem:[%s1639_s1 + $0x8] ss:$16 sps:$4 sm:$0xff]  }
  0x14   :  { %730 = vmatpush1.bf16.msra.mxu1 %v1111_v20  ;;  %678 = vmatprep.subr.bf16.mxu0 %v1112_v21  ;;  %v1145_v43 = vld [vmem:[%s1639_s1 + $0x1a4] ss:$16 sps:$4 sm:$0xff]   ;;  %v1150_v46 = vld [vmem:[%s1639_s1 + $0x1a0] ss:$16 sps:$4 sm:$0xff]   ;;  %v1187_v8 = vld [vmem:[%s1639_s1 + $0x2e8] ss:$16 sps:$4 sm:$0xff]  }
  0x15   :  { %731 = vmatprep.subr.bf16.mxu1 %v1114_v22  ;;  %v1151_v47 = vld [vmem:[%s1639_s1 + $0x184] ss:$16 sps:$4 sm:$0xff]   ;;  %v1156_v50 = vld [vmem:[%s1639_s1 + $0x180] ss:$16 sps:$4 sm:$0xff]   ;;  %v1493_v9 = vld [vmem:[%s1640_s0 + $0x2c] ss:$16 sps:$4 sm:$0xff]  }
  0x16   :  { %v1157_v51 = vld [vmem:[%s1639_s1 + $0x164] ss:$16 sps:$4 sm:$0xff]   ;;  %v1162_v55 = vld [vmem:[%s1639_s1 + $0x160] ss:$16 sps:$4 sm:$0xff]   ;;  %v1498_v10 = vld [vmem:[%s1640_s0 + $0x28] ss:$16 sps:$4 sm:$0xff]  }
  0x17   :  { %679 = vmatpush1.bf16.msra.mxu0 %v1116_v23  ;;  %v1183_v53 = vld [vmem:[%s1640_s0 + $0x4] ss:$16 sps:$4 sm:$0xff]   ;;  %v1168_v59 = vld [vmem:[%s1639_s1 + $0x140] ss:$16 sps:$4 sm:$0xff]   ;;  %v1192_v11 = vld [vmem:[%s1639_s1 + $0x1ec] ss:$16 sps:$4 sm:$0xff]  }
  0x18   :  { %732 = vmatpush1.bf16.msra.mxu1 %v1117_v24  ;;  %680 = vmatprep.subr.bf16.mxu0 %v1118_v25  ;;  %v1163_v56 = vld [vmem:[%s1639_s1 + $0x144] ss:$16 sps:$4 sm:$0xff]   ;;  %v1174_v63 = vld [vmem:[%s1639_s1 + $0x120] ss:$16 sps:$4 sm:$0xff]   ;;  %v1195_v12 = vld [vmem:[%s1639_s1 + $0x2cc] ss:$16 sps:$4 sm:$0xff]  }
  0x19   :  { %733 = vmatprep.subr.bf16.mxu1 %v1120_v26  ;;  %700 = vmatprep.mubr.bf16.mxu0 %v1183_v53  ;;  %v1169_v60 = vld [vmem:[%s1639_s1 + $0x124] ss:$16 sps:$4 sm:$0xff]   ;;  %v1180_v3 = vld [vmem:[%s1639_s1 + $0x100] ss:$16 sps:$4 sm:$0xff]   ;;  %v1190_v14 = vld [vmem:[%s1639_s1 + $0x1e8] ss:$16 sps:$4 sm:$0xff]  }
  0x1a   :  { %v1175_v0 = vld [vmem:[%s1639_s1 + $0x104] ss:$16 sps:$4 sm:$0xff]   ;;  %v1479_v5 = vld [vmem:[%s1640_s0] ss:$16 sps:$4 sm:$0xff]   ;;  %v1193_v15 = vld [vmem:[%s1639_s1 + $0x2c8] ss:$16 sps:$4 sm:$0xff]  }
  0x1b   :  { %681 = vmatpush1.bf16.msra.mxu0 %v1122_v27  ;;  %v1509_v13 = vld [vmem:[%s1640_s0 + $0x24] ss:$16 sps:$4 sm:$0xff]   ;;  %v1198_v16 = vld [vmem:[%s1639_s1 + $0x1cc] ss:$16 sps:$4 sm:$0xff]   ;;  %v1196_v18 = vld [vmem:[%s1639_s1 + $0x1c8] ss:$16 sps:$4 sm:$0xff]  }
  0x1c   :  { %734 = vmatpush1.bf16.msra.mxu1 %v1123_v28  ;;  %682 = vmatprep.subr.bf16.mxu0 %v1124_v29  ;;  %v1201_v17 = vld [vmem:[%s1639_s1 + $0x2ac] ss:$16 sps:$4 sm:$0xff]   ;;  %v1534_v19 = vld [vmem:[%s1640_s0 + $0x20] ss:$16 sps:$4 sm:$0xff]   ;;  %v1199_v20 = vld [vmem:[%s1639_s1 + $0x2a8] ss:$16 sps:$4 sm:$0xff]  }
  0x1d   :  { %735 = vmatprep.subr.bf16.mxu1 %v1126_v30  ;;  %v892_v21 = vld [vmem:[%s1641_s2] sm:$0xff]  ;;  %v894_v22 = vld [vmem:[%s1641_s2 + $0x10] sm:$0xff]  ;;  %v1204_v23 = vld [vmem:[%s1639_s1 + $0x1ac] ss:$16 sps:$4 sm:$0xff]  }
  0x1e   :  { %v1207_v24 = vld [vmem:[%s1639_s1 + $0x28c] ss:$16 sps:$4 sm:$0xff]   ;;  %898 = vperm.xlu0 %1080, %v892_v21   ;;  %908 = vperm.xlu1 %1081, %v894_v22   ;;  %v1202_v26 = vld [vmem:[%s1639_s1 + $0x1a8] ss:$16 sps:$4 sm:$0xff]  }
  0x1f   :  { %683 = vmatpush1.bf16.msra.mxu0 %v1128_v32  ;;  %v893_v25 = vld [vmem:[%s1641_s2 + $0x8] sm:$0xff]  ;;  %v895_v28 = vld [vmem:[%s1641_s2 + $0x18] sm:$0xff] }
  0x20   :  { %736 = vmatpush1.bf16.msra.mxu1 %v1129_v33  ;;  %684 = vmatprep.subr.bf16.mxu0 %v1130_v34  ;;  %v1205_v27 = vld [vmem:[%s1639_s1 + $0x288] ss:$16 sps:$4 sm:$0xff]   ;;  %v1210_v29 = vld [vmem:[%s1639_s1 + $0x18c] ss:$16 sps:$4 sm:$0xff]  }
  0x21   :  { %751 = vmatprep.subr.bf16.mxu1 %v1132_v35  ;;  %v1213_v30 = vld [vmem:[%s1639_s1 + $0x26c] ss:$16 sps:$4 sm:$0xff]   ;;  %v1208_v32 = vld [vmem:[%s1639_s1 + $0x188] ss:$16 sps:$4 sm:$0xff]  }
  0x22   :  { %903 = vperm.xlu0 %1080, %v893_v25   ;;  %913 = vperm.xlu1 %1081, %v895_v28   ;;  %v1211_v33 = vld [vmem:[%s1639_s1 + $0x268] ss:$16 sps:$4 sm:$0xff]   ;;  %v1216_v34 = vld [vmem:[%s1639_s1 + $0x16c] ss:$16 sps:$4 sm:$0xff]  }
  0x23   :  { %685 = vmatpush2.bf16.msra.mxu0 %v1134_v36  ;;  %v1214_v35 = vld [vmem:[%s1639_s1 + $0x168] ss:$16 sps:$4 sm:$0xff]  }
  0x24   :  { %752 = vmatpush2.bf16.msra.mxu1 %v1135_v37  ;;  %686 = vmatprep.subr.bf16.mxu0 %v1139_v38  ;;  %v1217_v36 = vld [vmem:[%s1639_s1 + $0x248] ss:$16 sps:$4 sm:$0xff]   ;;  %v1228_v37 = vld [vmem:[%s1639_s1 + $0x14c] ss:$16 sps:$4 sm:$0xff]  }
  0x25   :  { %774 = vmatprep.subr.bf16.mxu1 %v1143_v39  ;;  %v1231_v38 = vld [vmem:[%s1639_s1 + $0x22c] ss:$16 sps:$4 sm:$0xff]   ;;  %v1226_v39 = vld [vmem:[%s1639_s1 + $0x148] ss:$16 sps:$4 sm:$0xff]  }
  0x27   :  { %754 = vmatmul.mubr.bf16.vlgmr.msra.gmra.mxu1 %v1389_v40  ;;  %687 = vmatpush2.bf16.msra.mxu0 %v1144_v42  ;;  %v1234_v42 = vld [vmem:[%s1639_s1 + $0x12c] ss:$16 sps:$4 sm:$0xff]  }
  0x28   :  { %775 = vmatpush1.bf16.msra.mxu1 %v1141_v41  ;;  %688 = vmatprep.subr.bf16.mxu0 %v1145_v43  ;;  %v1229_v41 = vld [vmem:[%s1639_s1 + $0x228] ss:$16 sps:$4 sm:$0xff]   ;;  %v1237_v43 = vld [vmem:[%s1639_s1 + $0x20c] ss:$16 sps:$4 sm:$0xff]  }
  0x29   :  { %776 = vmatprep.subr.bf16.mxu1 %v1149_v44  ;;  %1057 = vmatprep.mubr.msk.bf16.mxu1 %vm661_vm0, %v1493_v9  ;;  %v1232_v44 = vld [vmem:[%s1639_s1 + $0x128] ss:$16 sps:$4 sm:$0xff]  }
  0x2b   :  { %689 = vmatpush2.bf16.msra.mxu0 %v1150_v46  ;;  %v1240_v46 = vld [vmem:[%s1639_s1 + $0x10c] ss:$16 sps:$4 sm:$0xff]  }
  0x2c   :  { %777 = vmatpush1.bf16.msra.mxu1 %v1147_v45  ;;  %690 = vmatprep.subr.bf16.mxu0 %v1151_v47  ;;  %v1235_v45 = vld [vmem:[%s1639_s1 + $0x208] ss:$16 sps:$4 sm:$0xff]   ;;  %v1243_v47 = vld [vmem:[%s1639_s1 + $0x30c] ss:$16 sps:$4 sm:$0xff]  }
  0x2d   :  { %778 = vmatprep.subr.bf16.mxu1 %v1155_v48  ;;  %v1238_v48 = vld [vmem:[%s1639_s1 + $0x108] ss:$16 sps:$4 sm:$0xff]  }
  0x2f   :  { %691 = vmatpush2.bf16.msra.mxu0 %v1156_v50  ;;  %764 = vmatmul.mubr.bf16.gmra.mxu1 %v1498_v10 }
  0x30   :  { %779 = vmatpush1.bf16.msra.mxu1 %v1153_v49  ;;  %692 = vmatprep.subr.bf16.mxu0 %v1157_v51  ;;  %v1241_v49 = vld [vmem:[%s1639_s1 + $0x308] ss:$16 sps:$4 sm:$0xff]  }
  0x31   :  { %780 = vmatprep.subr.bf16.mxu1 %v1161_v52  ;;  %806 = vmatprep.mubr.bf16.mxu1 %v1183_v53 }
  0x33   :  { %693 = vmatpush2.bf16.msra.mxu0 %v1162_v55 }
  0x34   :  { %781 = vmatpush1.bf16.msra.mxu1 %v1159_v54  ;;  %694 = vmatprep.subr.bf16.mxu0 %v1163_v56 }
  0x35   :  { %782 = vmatprep.subr.bf16.mxu1 %v1167_v57 }
  0x37   :  { %695 = vmatpush2.bf16.msra.mxu0 %v1168_v59 }
  0x38   :  { %783 = vmatpush1.bf16.msra.mxu1 %v1165_v58  ;;  %696 = vmatprep.subr.bf16.mxu0 %v1169_v60 }
  0x39   :  { %784 = vmatprep.subr.bf16.mxu1 %v1173_v61 }
  0x3b   :  { %697 = vmatpush2.bf16.msra.mxu0 %v1174_v63 }
  0x3c   :  { %785 = vmatpush1.bf16.msra.mxu1 %v1171_v62  ;;  %698 = vmatprep.subr.bf16.mxu0 %v1175_v0 }
  0x3d   :  { %786 = vmatprep.subr.bf16.mxu1 %v1179_v1 }
  0x3f   :  { %699 = vmatpush2.bf16.msra.mxu0 %v1180_v3 }
  0x40   :  { %787 = vmatpush1.bf16.msra.mxu1 %v1177_v2  ;;  %827 = vmatprep.subr.bf16.mxu0 %v1189_v6 }
  0x41   :  { %788 = vmatprep.subr.bf16.mxu1 %v1186_v4 }
  0x42   :  { %701 = vmatmul.mubr.bf16.vlgmr.msra.gmra.mxu0 %v1479_v5 }
  0x43   :  { %828 = vmatpush1.bf16.msra.mxu0 %v1187_v8  ;;  %710 = vmatprep.mubr.bf16.mxu0 %v1509_v13 }
  0x44   :  { %789 = vmatpush1.bf16.msra.mxu1 %v1184_v7  ;;  %829 = vmatprep.subr.bf16.mxu0 %v1195_v12 }
  0x45   :  { %790 = vmatprep.subr.bf16.mxu1 %v1192_v11 }
  0x47   :  { %830 = vmatpush1.bf16.msra.mxu0 %v1193_v15 }
  0x48   :  { %791 = vmatpush2.bf16.msra.mxu1 %v1190_v14  ;;  %831 = vmatprep.subr.bf16.mxu0 %v1201_v17 }
  0x49   :  { %792 = vmatprep.subr.bf16.mxu1 %v1198_v16 }
  0x4a   :  { %711 = vmatmul.mubr.bf16.gmra.mxu0 %v1534_v19 }
  0x4b   :  { %832 = vmatpush1.bf16.msra.mxu0 %v1199_v20  ;;  %1058 = vmatprep.mubr.msk.bf16.mxu0 %vm661_vm0, %v1358_v31  ;;  %v1219_v31 = vld [vmem:[%s1639_s1 + $0x24c] ss:$16 sps:$4 sm:$0xff]  }
  0x4c   :  { %793 = vmatpush2.bf16.msra.mxu1 %v1196_v18  ;;  %833 = vmatprep.subr.bf16.mxu0 %v1207_v24 }
  0x4d   :  { %794 = vmatprep.subr.bf16.mxu1 %v1204_v23 }
  0x4f   :  { %834 = vmatpush1.bf16.msra.mxu0 %v1205_v27 }
  0x50   :  { %795 = vmatpush2.bf16.msra.mxu1 %v1202_v26  ;;  %835 = vmatprep.subr.bf16.mxu0 %v1213_v30 }
  0x51   :  { %796 = vmatprep.subr.bf16.mxu1 %v1210_v29 }
  0x53   :  { %836 = vmatpush1.bf16.msra.mxu0 %v1211_v33 }
  0x54   :  { %797 = vmatpush2.bf16.msra.mxu1 %v1208_v32  ;;  %837 = vmatprep.subr.bf16.mxu0 %v1219_v31 }
  0x55   :  { %798 = vmatprep.subr.bf16.mxu1 %v1216_v34 }
  0x57   :  { %838 = vmatpush1.bf16.msra.mxu0 %v1217_v36 }
  0x58   :  { %799 = vmatpush2.bf16.msra.mxu1 %v1214_v35  ;;  %839 = vmatprep.subr.bf16.mxu0 %v1231_v38 }
  0x59   :  { %800 = vmatprep.subr.bf16.mxu1 %v1228_v37 }
  0x5b   :  { %840 = vmatpush1.bf16.msra.mxu0 %v1229_v41 }
  0x5c   :  { %801 = vmatpush2.bf16.msra.mxu1 %v1226_v39  ;;  %841 = vmatprep.subr.bf16.mxu0 %v1237_v43 }
  0x5d   :  { %802 = vmatprep.subr.bf16.mxu1 %v1234_v42 }
  0x5f   :  { %842 = vmatpush1.bf16.msra.mxu0 %v1235_v45 }
  0x60   :  { %803 = vmatpush2.bf16.msra.mxu1 %v1232_v44  ;;  %857 = vmatprep.subr.bf16.mxu0 %v1243_v47 }
  0x61   :  { %804 = vmatprep.subr.bf16.mxu1 %v1240_v46 }
  0x63   :  { %858 = vmatpush2.bf16.msra.mxu0 %v1241_v49 }
  0x64   :  { %805 = vmatpush2.bf16.msra.mxu1 %v1238_v48 }
  0x66   :  { %860 = vmatmul.mubr.bf16.vlgmr.msra.gmra.mxu0 %v1389_v40 }
  0x67   :  { %807 = vmatmul.mubr.bf16.vlgmr.msra.gmra.mxu1 %v1479_v5  ;;  %1059 = vmatprep.mubr.msk.bf16.mxu0 %vm661_vm0, %v1493_v9 }
  0x68   :  { %816 = vmatprep.mubr.bf16.mxu1 %v1509_v13 }
  0x6e   :  { %870 = vmatmul.mubr.bf16.gmra.mxu0 %v1498_v10 }
  0x6f   :  { %817 = vmatmul.mubr.bf16.gmra.mxu1 %v1534_v19 }
  0x99   :  { %v899_v9 = vpop.permute.xlu0 %898  ;;  %v909_v41 = vpop.permute.xlu1 %908 }
  0x9d   :  { %v904_v27 = vpop.permute.xlu0 %903 }
  0xe7   :  { %v755_v50 = vpop.f32.mrf.mxu1 }
  0xe9   :  { %v757_v52 = vpop.f32.mrf.mxu1 }
  0xeb   :  { %v759_v54 = vpop.f32.mrf.mxu1 }
  0xed   :  { %v761_v56 = vpop.f32.mrf.mxu1 }
  0xef   :  { %v765_v59 = vpop.f32.mrf.mxu1 }
  0xf1   :  { %v767_v60 = vpop.f32.mrf.mxu1 }
  0xf3   :  { %v769_v62 = vpop.f32.mrf.mxu1 }
  0xf5   :  { %v771_v0 = vpop.f32.mrf.mxu1 }
 0x102   :  { %v702_v51 = vpop.f32.mrf.mxu0 }
 0x103   :  { %v756_v6 = vadd.f32 %v755_v50, %v702_v51 }
 0x104   :  { %v704_v53 = vpop.f32.mrf.mxu0 }
 0x105   :  { %v758_v3 = vadd.f32 %v757_v52, %v704_v53 }
 0x106   :  { %v706_v55 = vpop.f32.mrf.mxu0 }
 0x107   :  { %v880_v12 = vmax.f32 %v756_v6, %v758_v3  ;;  %v760_v17 = vadd.f32 %v759_v54, %v706_v55  ;;  %v914_v55 = vpop.permute.xlu1 %913 }
 0x108   :  { %v708_v57 = vpop.f32.mrf.mxu0 }
 0x109   :  { %v762_v13 = vadd.f32 %v761_v56, %v708_v57 }
 0x10a   :  { %v712_v58 = vpop.f32.mrf.mxu0 }
 0x10b   :  { %v766_v21 = vadd.f32 %v765_v59, %v712_v58  ;;  %v881_v25 = vmax.f32 %v760_v17, %v762_v13 }
 0x10c   :  { %v714_v40 = vpop.f32.mrf.mxu0 }
 0x10d   :  { %v768_v22 = vadd.f32 %v767_v60, %v714_v40 }
 0x10e   :  { %v716_v61 = vpop.f32.mrf.mxu0 }
 0x10f   :  { %v882_v31 = vmax.f32 %v766_v21, %v768_v22  ;;  %v770_v37 = vadd.f32 %v769_v62, %v716_v61 }
 0x110   :  { %v718_v63 = vpop.f32.mrf.mxu0 }
 0x111   :  { %v772_v38 = vadd.f32 %v771_v0, %v718_v63 }
 0x113   :  { %v883_v50 = vmax.f32 %v770_v37, %v772_v38 }
 0x126   :  { %v861_v2 = vpop.f32.mrf.mxu0 }
 0x127   :  { %v808_v1 = vpop.f32.mrf.mxu1 }
 0x128   :  { %v863_v5 = vpop.f32.mrf.mxu0  ;;  %v862_v7 = vadd.f32 %v861_v2, %v808_v1 }
 0x129   :  { %v810_v4 = vpop.f32.mrf.mxu1 }
 0x12a   :  { %v864_v8 = vadd.f32 %v863_v5, %v810_v4  ;;  %v865_v11 = vpop.f32.mrf.mxu0 }
 0x12b   :  { %v812_v10 = vpop.f32.mrf.mxu1 }
 0x12c   :  { %v884_v14 = vmax.f32 %v862_v7, %v864_v8  ;;  %v867_v16 = vpop.f32.mrf.mxu0  ;;  %v866_v18 = vadd.f32 %v865_v11, %v812_v10 }
 0x12d   :  { %v814_v15 = vpop.f32.mrf.mxu1 }
 0x12e   :  { %v868_v19 = vadd.f32 %v867_v16, %v814_v15  ;;  %v888_v20 = vmax.f32 %v880_v12, %v884_v14  ;;  %v871_v24 = vpop.f32.mrf.mxu0 }
 0x12f   :  { %v818_v23 = vpop.f32.mrf.mxu1 }
 0x130   :  { %v885_v26 = vmax.f32 %v866_v18, %v868_v19  ;;  %v916_v28 = vadd.f32 %v899_v9, %v888_v20  ;;  %v873_v30 = vpop.f32.mrf.mxu0  ;;  %v872_v32 = vadd.f32 %v871_v24, %v818_v23 }
 0x131   :  { %v820_v29 = vpop.f32.mrf.mxu1 }
 0x132   :  { %v874_v33 = vadd.f32 %v873_v30, %v820_v29  ;;  %v889_v34 = vmax.f32 %v881_v25, %v885_v26  ;;  %v875_v36 = vpop.f32.mrf.mxu0  ;;  %v920_v43 = vmax.f32 %v916_v28, 0.0 }
 0x133   :  { %v822_v35 = vpop.f32.mrf.mxu1 }
 0x134   :  { %v886_v39 = vmax.f32 %v872_v32, %v874_v33  ;;  %v917_v42 = vadd.f32 %v904_v27, %v889_v34  ;;  %v877_v45 = vpop.f32.mrf.mxu0  ;;  %v876_v48 = vadd.f32 %v875_v36, %v822_v35 }
 0x135   :  { %v824_v44 = vpop.f32.mrf.mxu1 }
 0x136   :  { %v890_v46 = vmax.f32 %v882_v31, %v886_v39  ;;  %v921_v47 = vmax.f32 %v917_v42, 0.0  ;;  %v878_v49 = vadd.f32 %v877_v45, %v824_v44 }
 0x138   :  { %v1071_v51 = vpack.c.bf16 %v921_v47, %v920_v43  ;;  %v887_v52 = vmax.f32 %v876_v48, %v878_v49  ;;  %v918_v53 = vadd.f32 %v909_v41, %v890_v46 }
 0x13a   :  { %1072 = vst [vmem:[%s1642_s3] sm:$0xff] %v1071_v51   ;;  %v891_v54 = vmax.f32 %v883_v50, %v887_v52  ;;  %v922_v57 = vmax.f32 %v918_v53, 0.0 }
 0x13c   :  { %v919_v56 = vadd.f32 %v914_v55, %v891_v54 }
 0x13e   :  { %v923_v58 = vmax.f32 %v919_v56, 0.0 }
 0x140   :  { %v1076_v59 = vpack.c.bf16 %v923_v58, %v922_v57 }
 0x142   :  { %1078 = vst [vmem:[%s1642_s3 + $0x8] sm:$0xff] %v1076_v59  }

// kernel: cnn_model_forward.5
= control target key start
LH: loop header
LB: loop body
LE: loop exit
PB: predicated region body
PF: predicated region fallthrough
CT: control target
= control target key end

     0   :  { %v515_v1 = vmov 0   ;;  %s656_s1 = inlined_call_operand.vmem [shape: bf16[512,128], index: 1, kind: input, shape index: {}]   ;;  %s657_s0 = inlined_call_operand.vmem [shape: bf16[16,512], index: 0, kind: input, shape index: {}]   ;;  %s658_s2 = inlined_call_operand.vmem [shape: f32[16,1], index: 2, kind: input, shape index: {}]   ;;  %s659_s3 = inlined_call_operand.vmem [shape: f32[16,128], index: 3, kind: output, shape index: {}]  }
   0x1   :  { %v477_v0 = vld [vmem:[%s656_s1 + $0x78] sm:$0xff]   ;;  %476 = vset.pattern.permute.xlu0 %v515_v1  ;;  %v481_v5 = vld [vmem:[%s656_s1 + $0x70] sm:$0xff]   ;;  %v485_v9 = vld [vmem:[%s656_s1 + $0x68] sm:$0xff]  }
   0x2   :  { %v478_v2 = vld [vmem:[%s656_s1 + $0xf8] sm:$0xff]   ;;  %431 = vmatprep.subr.bf16.mxu0 %v477_v0  ;;  %v482_v6 = vld [vmem:[%s656_s1 + $0xf0] sm:$0xff]   ;;  %v486_v10 = vld [vmem:[%s656_s1 + $0xe8] sm:$0xff]  }
   0x3   :  { %v479_v3 = vld [vmem:[%s656_s1 + $0x38] sm:$0xff]   ;;  %453 = vmatprep.subr.bf16.mxu1 %v478_v2  ;;  %v483_v7 = vld [vmem:[%s656_s1 + $0x30] sm:$0xff]   ;;  %v487_v11 = vld [vmem:[%s656_s1 + $0x28] sm:$0xff]  }
   0x4   :  { %v480_v4 = vld [vmem:[%s656_s1 + $0xb8] sm:$0xff]   ;;  %432 = vmatpush3.bf16.msra.mxu0 %v479_v3  ;;  %v484_v8 = vld [vmem:[%s656_s1 + $0xb0] sm:$0xff]   ;;  %v488_v12 = vld [vmem:[%s656_s1 + $0xa8] sm:$0xff]  }
   0x5   :  { %454 = vmatpush3.bf16.msra.mxu1 %v480_v4  ;;  %433 = vmatprep.subr.bf16.mxu0 %v481_v5  ;;  %v489_v13 = vld [vmem:[%s656_s1 + $0x60] sm:$0xff]   ;;  %v493_v17 = vld [vmem:[%s656_s1 + $0x58] sm:$0xff]   ;;  %v497_v21 = vld [vmem:[%s656_s1 + $0x50] sm:$0xff]  }
   0x6   :  { %455 = vmatprep.subr.bf16.mxu1 %v482_v6  ;;  %v490_v14 = vld [vmem:[%s656_s1 + $0xe0] sm:$0xff]   ;;  %v494_v18 = vld [vmem:[%s656_s1 + $0xd8] sm:$0xff]   ;;  %v498_v22 = vld [vmem:[%s656_s1 + $0xd0] sm:$0xff]  }
   0x7   :  { %v491_v15 = vld [vmem:[%s656_s1 + $0x20] sm:$0xff]   ;;  %v495_v19 = vld [vmem:[%s656_s1 + $0x18] sm:$0xff]   ;;  %v499_v23 = vld [vmem:[%s656_s1 + $0x10] sm:$0xff]  }
   0x8   :  { %434 = vmatpush3.bf16.msra.mxu0 %v483_v7  ;;  %v492_v16 = vld [vmem:[%s656_s1 + $0xa0] sm:$0xff]   ;;  %v496_v20 = vld [vmem:[%s656_s1 + $0x98] sm:$0xff]   ;;  %v500_v24 = vld [vmem:[%s656_s1 + $0x90] sm:$0xff]  }
   0x9   :  { %456 = vmatpush3.bf16.msra.mxu1 %v484_v8  ;;  %435 = vmatprep.subr.bf16.mxu0 %v485_v9  ;;  %v501_v25 = vld [vmem:[%s656_s1 + $0x48] sm:$0xff]   ;;  %v505_v29 = vld [vmem:[%s656_s1 + $0x40] sm:$0xff]  }
   0xa   :  { %457 = vmatprep.subr.bf16.mxu1 %v486_v10  ;;  %v502_v26 = vld [vmem:[%s656_s1 + $0xc8] sm:$0xff]   ;;  %v506_v30 = vld [vmem:[%s656_s1 + $0xc0] sm:$0xff]  }
   0xb   :  { %v503_v27 = vld [vmem:[%s656_s1 + $0x8] sm:$0xff]   ;;  %v507_v31 = vld [vmem:[%s656_s1] sm:$0xff]  }
   0xc   :  { %436 = vmatpush3.bf16.msra.mxu0 %v487_v11  ;;  %v504_v28 = vld [vmem:[%s656_s1 + $0x88] sm:$0xff]   ;;  %v508_v32 = vld [vmem:[%s656_s1 + $0x80] sm:$0xff]  }
   0xd   :  { %458 = vmatpush3.bf16.msra.mxu1 %v488_v12  ;;  %437 = vmatprep.subr.bf16.mxu0 %v489_v13  ;;  %v509_v33 = vld [vmem:[%s657_s0] ss:$16 sps:$4 sm:$0xff]   ;;  %v511_v34 = vld [vmem:[%s657_s0 + $0x4] ss:$16 sps:$4 sm:$0xff]   ;;  %v512_v35 = vld [vmem:[%s657_s0 + $0x8] ss:$16 sps:$4 sm:$0xff]  }
   0xe   :  { %459 = vmatprep.subr.bf16.mxu1 %v490_v14  ;;  %v514_v36 = vld [vmem:[%s657_s0 + $0xc] ss:$16 sps:$4 sm:$0xff]   ;;  %v83_v37 = vld [vmem:[%s658_s2] sm:$0xff]  ;;  %339 = vmatprep.mubr.bf16.mxu0 %v511_v34 }
   0xf   :  { %87 = vperm.xlu0 %476, %v83_v37   ;;  %380 = vmatprep.mubr.bf16.mxu1 %v514_v36  ;;  %v84_v38 = vld [vmem:[%s658_s2 + $0x8] sm:$0xff] }
  0x10   :  { %438 = vmatpush3.bf16.msra.mxu0 %v491_v15 }
  0x11   :  { %460 = vmatpush3.bf16.msra.mxu1 %v492_v16  ;;  %439 = vmatprep.subr.bf16.mxu0 %v493_v17 }
  0x12   :  { %461 = vmatprep.subr.bf16.mxu1 %v494_v18 }
  0x13   :  { %92 = vperm.xlu0 %476, %v84_v38  }
  0x14   :  { %440 = vmatpush3.bf16.msra.mxu0 %v495_v19 }
  0x15   :  { %462 = vmatpush3.bf16.msra.mxu1 %v496_v20  ;;  %441 = vmatprep.subr.bf16.mxu0 %v497_v21 }
  0x16   :  { %463 = vmatprep.subr.bf16.mxu1 %v498_v22 }
  0x18   :  { %442 = vmatpush3.bf16.msra.mxu0 %v499_v23 }
  0x19   :  { %464 = vmatpush3.bf16.msra.mxu1 %v500_v24  ;;  %443 = vmatprep.subr.bf16.mxu0 %v501_v25 }
  0x1a   :  { %465 = vmatprep.subr.bf16.mxu1 %v502_v26 }
  0x1c   :  { %444 = vmatpush3.bf16.msra.mxu0 %v503_v27 }
  0x1d   :  { %466 = vmatpush3.bf16.msra.mxu1 %v504_v28  ;;  %445 = vmatprep.subr.bf16.mxu0 %v505_v29 }
  0x1e   :  { %467 = vmatprep.subr.bf16.mxu1 %v506_v30 }
  0x20   :  { %446 = vmatpush3.bf16.msra.mxu0 %v507_v31 }
  0x21   :  { %468 = vmatpush3.bf16.msra.mxu1 %v508_v32 }
  0x23   :  { %340 = vmatmul.mubr.bf16.vlgmr.msra.gmra.mxu0 %v509_v33 }
  0x24   :  { %381 = vmatmul.mubr.bf16.vlgmr.msra.gmra.mxu1 %v512_v35 }
  0x8a   :  { %v88_v41 = vpop.permute.xlu0 %87 }
  0x8e   :  { %v93_v53 = vpop.permute.xlu0 %92 }
  0xe3   :  { %v447_v39 = vpop.f32.mrf.mxu0 }
  0xe4   :  { %v469_v40 = vpop.f32.mrf.mxu1 }
  0xe5   :  { %v448_v42 = vpop.f32.mrf.mxu0 }
  0xe6   :  { %v449_v43 = vadd.f32 %v448_v42, %v447_v39  ;;  %v470_v44 = vpop.f32.mrf.mxu1 }
  0xe7   :  { %v450_v45 = vpop.f32.mrf.mxu0  ;;  %v471_v47 = vadd.f32 %v470_v44, %v469_v40 }
  0xe8   :  { %v342_v46 = vadd.f32 %v449_v43, %v88_v41  ;;  %v472_v48 = vpop.f32.mrf.mxu1 }
  0xe9   :  { %v451_v49 = vpop.f32.mrf.mxu0 }
  0xea   :  { %v383_v50 = vadd.f32 %v471_v47, %v342_v46  ;;  %v452_v51 = vadd.f32 %v451_v49, %v450_v45  ;;  %v473_v52 = vpop.f32.mrf.mxu1 }
  0xeb   :  { %v474_v55 = vadd.f32 %v473_v52, %v472_v48 }
  0xec   :  { %389 = vst [vmem:[%s659_s3] sm:$0xff] %v383_v50  ;;  %v345_v54 = vadd.f32 %v452_v51, %v93_v53 }
  0xee   :  { %v386_v56 = vadd.f32 %v474_v55, %v345_v54 }
  0xf0   :  { %390 = vst [vmem:[%s659_s3 + $0x8] sm:$0xff] %v386_v56 }

</bundles_post_ra>
